<compile_context>
chip_gen: v7x
topology: tpu7x:2x2x1
jax: 0.10.0
libtpu: 0.0.40
codegen_flags: <defaults>
</compile_context>

<pallas_src>
import functools

import jax
import jax.numpy as jnp
from jax.experimental import pallas as pl
from jax.experimental.pallas import tpu as pltpu


# ----------------------------- configuration ---------------------------------

def make_layer_cfgs(in_size, out_size, capacity, n_layers, kernel_size, stride):
    """Mirror ConvNet.__init__ channel / stride / padding bookkeeping."""
    channels = [in_size] + [capacity * (2 ** i) for i in range(n_layers)]
    channels[-1] = channels[-2]
    strides = n_layers * [stride] if isinstance(stride, int) else list(stride)
    pad = (kernel_size - 1) // 2   # cc.get_padding(k, s, mode='centered')[0]
    cfgs = []
    for i in range(n_layers):
        cfgs.append(dict(c_in=channels[i], c_out=channels[i + 1], k=kernel_size,
                         stride=strides[i], pad=pad, act=True))
    # final 1x1 conv, no activation after it
    cfgs.append(dict(c_in=channels[-1], c_out=out_size, k=1, stride=1, pad=0, act=False))
    return cfgs


def init_convnet_params(key, cfgs):
    """PyTorch Conv1d default init (uniform +-1/sqrt(fan_in))."""
    params = []
    for cfg in cfgs:
        key, kw, kb = jax.random.split(key, 3)
        fan_in = cfg["c_in"] * cfg["k"]
        bound = 1.0 / jnp.sqrt(jnp.float32(fan_in))
        w = jax.random.uniform(kw, (cfg["c_out"], cfg["c_in"], cfg["k"]),
                               jnp.float32, minval=-bound, maxval=bound)
        b = jax.random.uniform(kb, (cfg["c_out"],),
                               jnp.float32, minval=-bound, maxval=bound)
        params.append(dict(cfg, w=w, b=b))
    return params


def _derive_plan(cfgs, length):
    """Static per-layer plan: lengths, phase-split factors and buffer widths.

    Layer l consumes its (zero-padded) input split into P_in = stride * P_out
    interleaved phases and produces its output split into P_out phases, where
    P_out = prod(strides of the downstream layers).  With that invariant every
    in-kernel read/write is a contiguous lane slice.
    """
    n = len(cfgs)
    p_out = [1] * n
    p_in = [1] * n
    p = 1
    for i in range(n - 1, -1, -1):
        p_out[i] = p
        p_in[i] = cfgs[i]["stride"] * p
        p = p_in[i]

    plan = []
    l_in = length
    for i, cfg in enumerate(cfgs):
        s, k, pad = cfg["stride"], cfg["k"], cfg["pad"]
        l_out = (l_in + 2 * pad - k) // s + 1
        if l_out % p_out[i] != 0:
            # TODO(synk): support ragged lengths with a masked tail.
            raise ValueError(
                f"layer {i}: l_out={l_out} must be divisible by downstream "
                f"stride product {p_out[i]} (pad the input length).")
        m_out = l_out // p_out[i]
        # widest column index read by this layer's conv ...
        e_max = (s * (p_out[i] - 1) + k - 1) // p_in[i]
        # ... and widest column holding valid (padded) input data.
        a_in = max(m_out + e_max, (pad + l_in - 1) // p_in[i] + 1)
        plan.append(dict(cfg, l_in=l_in, l_out=l_out, p_in=p_in[i],
                         p_out=p_out[i], m_out=m_out, a_in=a_in))
        l_in = l_out
    return plan


# --------------------------------- kernel ------------------------------------

def _fused_convnet_kernel(*refs, plan):
    """One grid step = one batch element; the whole conv stack runs in VMEM.

    refs = [x_phases, (w2d, bias) * n_layers, feat * n_layers, buf * (n_layers-1)]
      x_phases : (P_in1, C_in1, A_1)        phase-split, zero-padded input
      w2d      : (C_out, K*C_in)            tap-folded, pre-transposed weights
      bias     : (C_out, 1)
      feat     : (P_out, C_out, M)          pre-activation features (phase-split)
      buf      : (P_in, C_in, A_in)         next layer's padded input phases (scratch)
    """
    n = len(plan)
    x_ref = refs[0]
    w_refs = [refs[1 + 2 * i] for i in range(n)]
    b_refs = [refs[2 + 2 * i] for i in range(n)]
    feat_refs = refs[1 + 2 * n: 1 + 3 * n]
    buf_refs = refs[1 + 3 * n:]

    # Zero the padded phase buffers once per batch element: the conv's left/right
    # zero padding and any halo columns beyond the valid data read as 0 from here on.
    for buf in buf_refs:
        buf[...] = jnp.zeros_like(buf)

    cur = x_ref                                   # layer-1 input comes from HBM tile
    for i, lc in enumerate(plan):
        w2d = w_refs[i][...]                      # (C_out, K*C_in) resident weights
        bias = b_refs[i][...]                     # (C_out, 1)
        xin = cur[...]                            # (P_in, C_in, A_in)
        s, ksz = lc["stride"], lc["k"]
        p_in, p_out, m = lc["p_in"], lc["p_out"], lc["m_out"]
        nxt = buf_refs[i] if i + 1 < n else None
        nxt_pad = plan[i + 1]["pad"] if i + 1 < n else 0

        for q in range(p_out):                    # static unroll over output phases
            # Fold all K taps into one contraction: each tap is a contiguous slice
            # of one input phase buffer (t = s*q + k = p_in*e + r).
            parts = []
            for k in range(ksz):
                t = s * q + k
                e, r = t // p_in, t % p_in
                parts.append(xin[r, :, e:e + m])              # (C_in, M)
            rhs = parts[0] if ksz == 1 else jnp.concatenate(parts, axis=0)
            y = jnp.dot(w2d, rhs, preferred_element_type=jnp.float32) + bias
            feat_refs[i][q] = y.astype(feat_refs[i].dtype)    # pre-activation feature

            if nxt is not None:
                # Fused LeakyReLU(0.2), then scatter this output phase into the
                # consumer's padded phase buffer at its (static) phase / offset.
                a = jnp.where(y > 0, y, 0.2 * y) if lc["act"] else y
                rr = (q + nxt_pad) % p_out
                a0 = (q + nxt_pad) // p_out
                nxt[rr, :, a0:a0 + m] = a
        cur = nxt


# ------------------------------- host wrapper ---------------------------------

def convnet_forward(params, x):
    """Reproduces ConvNet.forward: list of conv outputs (pre-activation), NCL layout."""
    n_batch, c_in, length = x.shape
    plan = _derive_plan(params, length)
    n = len(plan)

    # Phase-split the padded input ONCE (single cheap reshape/transpose of x).
    p1, a1, pad1 = plan[0]["p_in"], plan[0]["a_in"], plan[0]["pad"]
    total = p1 * a1
    x_pad = jnp.pad(x, ((0, 0), (0, 0), (pad1, total - length - pad1)))
    x_ph = x_pad.reshape(n_batch, c_in, a1, p1).transpose(0, 3, 1, 2)  # (N,P1,C,A1)

    flat_inputs = [x_ph]
    in_specs = [pl.BlockSpec((None, p1, c_in, a1), lambda i: (i, 0, 0, 0))]
    for lc in plan:
        # Pre-transpose / tap-fold weights on the host: w2d[co, k*C_in + c] = W[co, c, k].
        w2d = jnp.transpose(lc["w"], (0, 2, 1)).reshape(lc["c_out"], lc["k"] * lc["c_in"])
        bcol = lc["b"].reshape(lc["c_out"], 1)
        flat_inputs += [w2d, bcol]
        in_specs += [pl.BlockSpec(w2d.shape, lambda i: (0, 0)),
                     pl.BlockSpec(bcol.shape, lambda i: (0, 0))]

    out_shape = tuple(
        jax.ShapeDtypeStruct((n_batch, lc["p_out"], lc["c_out"], lc["m_out"]), jnp.float32)
        for lc in plan)
    out_specs = tuple(
        pl.BlockSpec((None, lc["p_out"], lc["c_out"], lc["m_out"]),
                     lambda i: (i, 0, 0, 0))
        for lc in plan)
    scratch_shapes = [
        pltpu.VMEM((plan[i]["p_in"], plan[i]["c_in"], plan[i]["a_in"]), jnp.float32)
        for i in range(1, n)]

    # Sanity-bound per-step VMEM (inputs + outputs + scratch, x2 for double buffering).
    per_step = 4 * (p1 * c_in * a1
                    + sum(a.size for a in flat_inputs[1:])
                    + sum(lc["p_out"] * lc["c_out"] * lc["m_out"] for lc in plan)
                    + sum(plan[i]["p_in"] * plan[i]["c_in"] * plan[i]["a_in"]
                          for i in range(1, n)))
    vmem_cap = 32 * 1024 * 1024                   # safe on v5e / v6e / v7x
    assert 2 * per_step < vmem_cap, "fused stack does not fit VMEM; tile the length dim"

    flops = sum(2 * n_batch * lc["c_out"] * lc["c_in"] * lc["k"] * lc["l_out"]
                for lc in plan)
    bytes_accessed = 4 * (x_ph.size
                          + sum(a.size for a in flat_inputs[1:])
                          + sum(n_batch * lc["c_out"] * lc["l_out"] for lc in plan))

    feats_ph = pl.pallas_call(
        functools.partial(_fused_convnet_kernel, plan=plan),
        out_shape=out_shape,
        grid=(n_batch,),
        in_specs=in_specs,
        out_specs=out_specs,
        scratch_shapes=scratch_shapes,
        compiler_params=pltpu.CompilerParams(
            dimension_semantics=("parallel",),        # >=2 steps -> both v7x TCs busy
            vmem_limit_bytes=vmem_cap),
        cost_estimate=pl.CostEstimate(flops=flops, transcendentals=0,
                                      bytes_accessed=bytes_accessed),
    )(*flat_inputs)

    # Re-interleave the phase-split features back to (N, C_out, L_out).  Tiny tensors.
    feats = []
    for f, lc in zip(feats_ph, plan):
        feats.append(f.transpose(0, 2, 3, 1).reshape(n_batch, lc["c_out"], lc["l_out"]))
    return feats


# ----------------------------- pure-JAX reference -----------------------------

def _conv1d_ref(x, w, b, stride, padding):
    y = jax.lax.conv_general_dilated(
        x, w, window_strides=(stride,), padding=[(padding, padding)],
        dimension_numbers=("NCH", "OIH", "NCH"))
    return y + b[None, :, None]


def _convnet_forward_ref(params, x):
    feats = []
    for p in params:
        y = _conv1d_ref(x, p["w"], p["b"], p["stride"], p["pad"])
        feats.append(y)
        x = jnp.where(y > 0, y, 0.2 * y) if p["act"] else y
    return feats


# ----------------------------------- demo -------------------------------------

if __name__ == "__main__":
    key = jax.random.PRNGKey(0)
    key, kx = jax.random.split(key)

    # ConvNet(in_size=4, out_size=4, capacity=8, n_layers=3, kernel_size=5, stride=2)
    # on x of shape (2, 4, 512): channels [4, 8, 16, 16] -> 4, lengths 256/128/64/64.
    in_size, out_size, capacity, n_layers, kernel_size, stride = 4, 4, 8, 3, 5, 2
    x = jax.random.normal(kx, (2, in_size, 512), dtype=jnp.float32)

    cfgs = make_layer_cfgs(in_size, out_size, capacity, n_layers, kernel_size, stride)
    params = init_convnet_params(key, cfgs)

    features = convnet_forward(params, x)
    for f in features:
        jax.block_until_ready(f)

    # Numerical check against the pure-JAX reference convolution.
    ref_features = _convnet_forward_ref(params, x)
    assert len(features) == len(ref_features) == n_layers + 1
    for f, r in zip(features, ref_features):
        assert f.shape == r.shape, (f.shape, r.shape)
        assert jnp.allclose(f, r, rtol=1e-4, atol=1e-4), \
            float(jnp.max(jnp.abs(f - r)))

    print("KERNEL_OK")
</pallas_src>

<mosaic_0001>
module attributes {stable_mosaic.version = 11 : i64} {
  func.func @_fused_convnet_kernel(%arg0: i32, %arg1: memref<1x8x4x65xf32, #tpu.memory_space<vmem>>, %arg2: memref<8x20xf32, #tpu.memory_space<vmem>>, %arg3: memref<8x1xf32, #tpu.memory_space<vmem>>, %arg4: memref<16x40xf32, #tpu.memory_space<vmem>>, %arg5: memref<16x1xf32, #tpu.memory_space<vmem>>, %arg6: memref<16x80xf32, #tpu.memory_space<vmem>>, %arg7: memref<16x1xf32, #tpu.memory_space<vmem>>, %arg8: memref<4x16xf32, #tpu.memory_space<vmem>>, %arg9: memref<4x1xf32, #tpu.memory_space<vmem>>, %arg10: memref<1x4x8x64xf32, #tpu.memory_space<vmem>>, %arg11: memref<1x2x16x64xf32, #tpu.memory_space<vmem>>, %arg12: memref<1x1x16x64xf32, #tpu.memory_space<vmem>>, %arg13: memref<1x1x4x64xf32, #tpu.memory_space<vmem>>, %arg14: memref<4x8x65xf32, #tpu.memory_space<vmem>>, %arg15: memref<2x16x66xf32, #tpu.memory_space<vmem>>, %arg16: memref<1x16x64xf32, #tpu.memory_space<vmem>>) attributes {dimension_semantics = [#tpu.dimension_semantics<parallel>], iteration_bounds = array<i64: 2>, scalar_prefetch = 0 : i64, scratch_operands = 3 : i64, tpu.core_type = #tpu.core_type<tc>, window_params = [{transform_indices = @transform_0, window_bounds = array<i64: 1, 8, 4, 65>}, {pipeline_mode = #tpu.pipeline_mode<synchronous>, transform_indices = @transform_1, window_bounds = array<i64: 8, 20>}, {pipeline_mode = #tpu.pipeline_mode<synchronous>, transform_indices = @transform_2, window_bounds = array<i64: 8, 1>}, {pipeline_mode = #tpu.pipeline_mode<synchronous>, transform_indices = @transform_3, window_bounds = array<i64: 16, 40>}, {pipeline_mode = #tpu.pipeline_mode<synchronous>, transform_indices = @transform_4, window_bounds = array<i64: 16, 1>}, {pipeline_mode = #tpu.pipeline_mode<synchronous>, transform_indices = @transform_5, window_bounds = array<i64: 16, 80>}, {pipeline_mode = #tpu.pipeline_mode<synchronous>, transform_indices = @transform_6, window_bounds = array<i64: 16, 1>}, {pipeline_mode = #tpu.pipeline_mode<synchronous>, transform_indices = @transform_7, window_bounds = array<i64: 4, 16>}, {pipeline_mode = #tpu.pipeline_mode<synchronous>, transform_indices = @transform_8, window_bounds = array<i64: 4, 1>}, {transform_indices = @transform_9, window_bounds = array<i64: 1, 4, 8, 64>}, {transform_indices = @transform_10, window_bounds = array<i64: 1, 2, 16, 64>}, {transform_indices = @transform_11, window_bounds = array<i64: 1, 1, 16, 64>}, {transform_indices = @transform_12, window_bounds = array<i64: 1, 1, 4, 64>}]} {
    %cst = arith.constant 0.000000e+00 : f32
    %0 = vector.broadcast %cst : f32 to vector<4x8x65xf32>
    %c0 = arith.constant 0 : index
    %c0_0 = arith.constant 0 : index
    %c0_1 = arith.constant 0 : index
    %1 = vector.load %arg14[%c0, %c0_0, %c0_1] : memref<4x8x65xf32, #tpu.memory_space<vmem>>, vector<4x8x65xf32>
    tpu.vector_store %arg14[%c0, %c0_0, %c0_1], %0 {strides = array<i32>} : memref<4x8x65xf32, #tpu.memory_space<vmem>>, vector<4x8x65xf32>,
    %cst_2 = arith.constant 0.000000e+00 : f32
    %2 = vector.broadcast %cst_2 : f32 to vector<2x16x66xf32>
    %c0_3 = arith.constant 0 : index
    %c0_4 = arith.constant 0 : index
    %c0_5 = arith.constant 0 : index
    %3 = vector.load %arg15[%c0_3, %c0_4, %c0_5] : memref<2x16x66xf32, #tpu.memory_space<vmem>>, vector<2x16x66xf32>
    tpu.vector_store %arg15[%c0_3, %c0_4, %c0_5], %2 {strides = array<i32>} : memref<2x16x66xf32, #tpu.memory_space<vmem>>, vector<2x16x66xf32>,
    %cst_6 = arith.constant 0.000000e+00 : f32
    %4 = vector.broadcast %cst_6 : f32 to vector<1x16x64xf32>
    %c0_7 = arith.constant 0 : index
    %c0_8 = arith.constant 0 : index
    %c0_9 = arith.constant 0 : index
    %5 = vector.load %arg16[%c0_7, %c0_8, %c0_9] : memref<1x16x64xf32, #tpu.memory_space<vmem>>, vector<1x16x64xf32>
    tpu.vector_store %arg16[%c0_7, %c0_8, %c0_9], %4 {strides = array<i32>} : memref<1x16x64xf32, #tpu.memory_space<vmem>>, vector<1x16x64xf32>,
    %c0_10 = arith.constant 0 : index
    %c0_11 = arith.constant 0 : index
    %6 = vector.load %arg2[%c0_10, %c0_11] : memref<8x20xf32, #tpu.memory_space<vmem>>, vector<8x20xf32>
    %c0_12 = arith.constant 0 : index
    %c0_13 = arith.constant 0 : index
    %7 = vector.load %arg3[%c0_12, %c0_13] : memref<8x1xf32, #tpu.memory_space<vmem>>, vector<8x1xf32>
    %c0_14 = arith.constant 0 : index
    %c0_15 = arith.constant 0 : index
    %c0_16 = arith.constant 0 : index
    %c0_17 = arith.constant 0 : index
    %8 = vector.load %arg1[%c0_14, %c0_15, %c0_16, %c0_17] : memref<1x8x4x65xf32, #tpu.memory_space<vmem>>, vector<1x8x4x65xf32>
    %9 = vector.shape_cast %8 : vector<1x8x4x65xf32> to vector<8x4x65xf32>
    %10 = vector.extract_strided_slice %9 {offsets = [0, 0, 0], sizes = [1, 4, 64], strides = [1, 1, 1]} : vector<8x4x65xf32> to vector<1x4x64xf32>
    %11 = vector.shape_cast %10 : vector<1x4x64xf32> to vector<4x64xf32>
    %12 = vector.extract_strided_slice %9 {offsets = [1, 0, 0], sizes = [1, 4, 64], strides = [1, 1, 1]} : vector<8x4x65xf32> to vector<1x4x64xf32>
    %13 = vector.shape_cast %12 : vector<1x4x64xf32> to vector<4x64xf32>
    %14 = vector.extract_strided_slice %9 {offsets = [2, 0, 0], sizes = [1, 4, 64], strides = [1, 1, 1]} : vector<8x4x65xf32> to vector<1x4x64xf32>
    %15 = vector.shape_cast %14 : vector<1x4x64xf32> to vector<4x64xf32>
    %16 = vector.extract_strided_slice %9 {offsets = [3, 0, 0], sizes = [1, 4, 64], strides = [1, 1, 1]} : vector<8x4x65xf32> to vector<1x4x64xf32>
    %17 = vector.shape_cast %16 : vector<1x4x64xf32> to vector<4x64xf32>
    %18 = vector.extract_strided_slice %9 {offsets = [4, 0, 0], sizes = [1, 4, 64], strides = [1, 1, 1]} : vector<8x4x65xf32> to vector<1x4x64xf32>
    %19 = vector.shape_cast %18 : vector<1x4x64xf32> to vector<4x64xf32>
    %20 = tpu.concatenate %11, %13, %15, %17, %19 in 0 : vector<4x64xf32>, vector<4x64xf32>, vector<4x64xf32>, vector<4x64xf32>, vector<4x64xf32> -> vector<20x64xf32>
    %cst_18 = arith.constant dense<0.000000e+00> : vector<8x64xf32>
    %21 = tpu.matmul %6, %20, %cst_18 {dimension_numbers = #tpu.dot_dimension_numbers<[1], [0], [0], [1], [0, 0, 1, 1], [], []>} : vector<8x20xf32>, vector<20x64xf32>, vector<8x64xf32> -> vector<8x64xf32>
    %22 = vector.broadcast %7 : vector<8x1xf32> to vector<8x64xf32>
    %23 = arith.addf %21, %22 : vector<8x64xf32>
    %c0_19 = arith.constant 0 : index
    %c0_20 = arith.constant 0 : index
    %c0_21 = arith.constant 0 : index
    %c0_22 = arith.constant 0 : index
    %24 = vector.load %arg10[%c0_19, %c0_20, %c0_21, %c0_22] : memref<1x4x8x64xf32, #tpu.memory_space<vmem>>, vector<1x1x8x64xf32>
    %25 = vector.shape_cast %24 : vector<1x1x8x64xf32> to vector<8x64xf32>
    %26 = vector.shape_cast %23 : vector<8x64xf32> to vector<1x1x8x64xf32>
    tpu.vector_store %arg10[%c0_19, %c0_20, %c0_21, %c0_22], %26 {strides = array<i32>} : memref<1x4x8x64xf32, #tpu.memory_space<vmem>>, vector<1x1x8x64xf32>,
    %cst_23 = arith.constant 0.000000e+00 : f32
    %27 = vector.broadcast %cst_23 : f32 to vector<8x64xf32>
    %28 = arith.cmpf ogt, %23, %27 : vector<8x64xf32>
    %cst_24 = arith.constant 2.000000e-01 : f32
    %29 = vector.broadcast %cst_24 : f32 to vector<8x64xf32>
    %30 = arith.mulf %29, %23 : vector<8x64xf32>
    %31 = arith.select %28, %23, %30 : vector<8x64xi1>, vector<8x64xf32>
    %c2 = arith.constant 2 : index
    %c0_25 = arith.constant 0 : index
    %c0_26 = arith.constant 0 : index
    %32 = vector.load %arg14[%c2, %c0_25, %c0_26] : memref<4x8x65xf32, #tpu.memory_space<vmem>>, vector<1x8x64xf32>
    %33 = vector.shape_cast %32 : vector<1x8x64xf32> to vector<8x64xf32>
    %34 = vector.shape_cast %31 : vector<8x64xf32> to vector<1x8x64xf32>
    tpu.vector_store %arg14[%c2, %c0_25, %c0_26], %34 {strides = array<i32>} : memref<4x8x65xf32, #tpu.memory_space<vmem>>, vector<1x8x64xf32>,
    %35 = vector.extract_strided_slice %9 {offsets = [2, 0, 0], sizes = [1, 4, 64], strides = [1, 1, 1]} : vector<8x4x65xf32> to vector<1x4x64xf32>
    %36 = vector.shape_cast %35 : vector<1x4x64xf32> to vector<4x64xf32>
    %37 = vector.extract_strided_slice %9 {offsets = [3, 0, 0], sizes = [1, 4, 64], strides = [1, 1, 1]} : vector<8x4x65xf32> to vector<1x4x64xf32>
    %38 = vector.shape_cast %37 : vector<1x4x64xf32> to vector<4x64xf32>
    %39 = vector.extract_strided_slice %9 {offsets = [4, 0, 0], sizes = [1, 4, 64], strides = [1, 1, 1]} : vector<8x4x65xf32> to vector<1x4x64xf32>
    %40 = vector.shape_cast %39 : vector<1x4x64xf32> to vector<4x64xf32>
    %41 = vector.extract_strided_slice %9 {offsets = [5, 0, 0], sizes = [1, 4, 64], strides = [1, 1, 1]} : vector<8x4x65xf32> to vector<1x4x64xf32>
    %42 = vector.shape_cast %41 : vector<1x4x64xf32> to vector<4x64xf32>
    %43 = vector.extract_strided_slice %9 {offsets = [6, 0, 0], sizes = [1, 4, 64], strides = [1, 1, 1]} : vector<8x4x65xf32> to vector<1x4x64xf32>
    %44 = vector.shape_cast %43 : vector<1x4x64xf32> to vector<4x64xf32>
    %45 = tpu.concatenate %36, %38, %40, %42, %44 in 0 : vector<4x64xf32>, vector<4x64xf32>, vector<4x64xf32>, vector<4x64xf32>, vector<4x64xf32> -> vector<20x64xf32>
    %cst_27 = arith.constant dense<0.000000e+00> : vector<8x64xf32>
    %46 = tpu.matmul %6, %45, %cst_27 {dimension_numbers = #tpu.dot_dimension_numbers<[1], [0], [0], [1], [0, 0, 1, 1], [], []>} : vector<8x20xf32>, vector<20x64xf32>, vector<8x64xf32> -> vector<8x64xf32>
    %47 = vector.broadcast %7 : vector<8x1xf32> to vector<8x64xf32>
    %48 = arith.addf %46, %47 : vector<8x64xf32>
    %c0_28 = arith.constant 0 : index
    %c1 = arith.constant 1 : index
    %c0_29 = arith.constant 0 : index
    %c0_30 = arith.constant 0 : index
    %49 = vector.load %arg10[%c0_28, %c1, %c0_29, %c0_30] : memref<1x4x8x64xf32, #tpu.memory_space<vmem>>, vector<1x1x8x64xf32>
    %50 = vector.shape_cast %49 : vector<1x1x8x64xf32> to vector<8x64xf32>
    %51 = vector.shape_cast %48 : vector<8x64xf32> to vector<1x1x8x64xf32>
    tpu.vector_store %arg10[%c0_28, %c1, %c0_29, %c0_30], %51 {strides = array<i32>} : memref<1x4x8x64xf32, #tpu.memory_space<vmem>>, vector<1x1x8x64xf32>,
    %cst_31 = arith.constant 0.000000e+00 : f32
    %52 = vector.broadcast %cst_31 : f32 to vector<8x64xf32>
    %53 = arith.cmpf ogt, %48, %52 : vector<8x64xf32>
    %cst_32 = arith.constant 2.000000e-01 : f32
    %54 = vector.broadcast %cst_32 : f32 to vector<8x64xf32>
    %55 = arith.mulf %54, %48 : vector<8x64xf32>
    %56 = arith.select %53, %48, %55 : vector<8x64xi1>, vector<8x64xf32>
    %c3 = arith.constant 3 : index
    %c0_33 = arith.constant 0 : index
    %c0_34 = arith.constant 0 : index
    %57 = vector.load %arg14[%c3, %c0_33, %c0_34] : memref<4x8x65xf32, #tpu.memory_space<vmem>>, vector<1x8x64xf32>
    %58 = vector.shape_cast %57 : vector<1x8x64xf32> to vector<8x64xf32>
    %59 = vector.shape_cast %56 : vector<8x64xf32> to vector<1x8x64xf32>
    tpu.vector_store %arg14[%c3, %c0_33, %c0_34], %59 {strides = array<i32>} : memref<4x8x65xf32, #tpu.memory_space<vmem>>, vector<1x8x64xf32>,
    %60 = vector.extract_strided_slice %9 {offsets = [4, 0, 0], sizes = [1, 4, 64], strides = [1, 1, 1]} : vector<8x4x65xf32> to vector<1x4x64xf32>
    %61 = vector.shape_cast %60 : vector<1x4x64xf32> to vector<4x64xf32>
    %62 = vector.extract_strided_slice %9 {offsets = [5, 0, 0], sizes = [1, 4, 64], strides = [1, 1, 1]} : vector<8x4x65xf32> to vector<1x4x64xf32>
    %63 = vector.shape_cast %62 : vector<1x4x64xf32> to vector<4x64xf32>
    %64 = vector.extract_strided_slice %9 {offsets = [6, 0, 0], sizes = [1, 4, 64], strides = [1, 1, 1]} : vector<8x4x65xf32> to vector<1x4x64xf32>
    %65 = vector.shape_cast %64 : vector<1x4x64xf32> to vector<4x64xf32>
    %66 = vector.extract_strided_slice %9 {offsets = [7, 0, 0], sizes = [1, 4, 64], strides = [1, 1, 1]} : vector<8x4x65xf32> to vector<1x4x64xf32>
    %67 = vector.shape_cast %66 : vector<1x4x64xf32> to vector<4x64xf32>
    %68 = vector.extract_strided_slice %9 {offsets = [0, 0, 1], sizes = [1, 4, 64], strides = [1, 1, 1]} : vector<8x4x65xf32> to vector<1x4x64xf32>
    %69 = vector.shape_cast %68 : vector<1x4x64xf32> to vector<4x64xf32>
    %70 = tpu.concatenate %61, %63, %65, %67, %69 in 0 : vector<4x64xf32>, vector<4x64xf32>, vector<4x64xf32>, vector<4x64xf32>, vector<4x64xf32> -> vector<20x64xf32>
    %cst_35 = arith.constant dense<0.000000e+00> : vector<8x64xf32>
    %71 = tpu.matmul %6, %70, %cst_35 {dimension_numbers = #tpu.dot_dimension_numbers<[1], [0], [0], [1], [0, 0, 1, 1], [], []>} : vector<8x20xf32>, vector<20x64xf32>, vector<8x64xf32> -> vector<8x64xf32>
    %72 = vector.broadcast %7 : vector<8x1xf32> to vector<8x64xf32>
    %73 = arith.addf %71, %72 : vector<8x64xf32>
    %c0_36 = arith.constant 0 : index
    %c2_37 = arith.constant 2 : index
    %c0_38 = arith.constant 0 : index
    %c0_39 = arith.constant 0 : index
    %74 = vector.load %arg10[%c0_36, %c2_37, %c0_38, %c0_39] : memref<1x4x8x64xf32, #tpu.memory_space<vmem>>, vector<1x1x8x64xf32>
    %75 = vector.shape_cast %74 : vector<1x1x8x64xf32> to vector<8x64xf32>
    %76 = vector.shape_cast %73 : vector<8x64xf32> to vector<1x1x8x64xf32>
    tpu.vector_store %arg10[%c0_36, %c2_37, %c0_38, %c0_39], %76 {strides = array<i32>} : memref<1x4x8x64xf32, #tpu.memory_space<vmem>>, vector<1x1x8x64xf32>,
    %cst_40 = arith.constant 0.000000e+00 : f32
    %77 = vector.broadcast %cst_40 : f32 to vector<8x64xf32>
    %78 = arith.cmpf ogt, %73, %77 : vector<8x64xf32>
    %cst_41 = arith.constant 2.000000e-01 : f32
    %79 = vector.broadcast %cst_41 : f32 to vector<8x64xf32>
    %80 = arith.mulf %79, %73 : vector<8x64xf32>
    %81 = arith.select %78, %73, %80 : vector<8x64xi1>, vector<8x64xf32>
    %c0_42 = arith.constant 0 : index
    %c0_43 = arith.constant 0 : index
    %c1_44 = arith.constant 1 : index
    %82 = vector.load %arg14[%c0_42, %c0_43, %c1_44] : memref<4x8x65xf32, #tpu.memory_space<vmem>>, vector<1x8x64xf32>
    %83 = vector.shape_cast %82 : vector<1x8x64xf32> to vector<8x64xf32>
    %84 = vector.shape_cast %81 : vector<8x64xf32> to vector<1x8x64xf32>
    tpu.vector_store %arg14[%c0_42, %c0_43, %c1_44], %84 {strides = array<i32>} : memref<4x8x65xf32, #tpu.memory_space<vmem>>, vector<1x8x64xf32>,
    %85 = vector.extract_strided_slice %9 {offsets = [6, 0, 0], sizes = [1, 4, 64], strides = [1, 1, 1]} : vector<8x4x65xf32> to vector<1x4x64xf32>
    %86 = vector.shape_cast %85 : vector<1x4x64xf32> to vector<4x64xf32>
    %87 = vector.extract_strided_slice %9 {offsets = [7, 0, 0], sizes = [1, 4, 64], strides = [1, 1, 1]} : vector<8x4x65xf32> to vector<1x4x64xf32>
    %88 = vector.shape_cast %87 : vector<1x4x64xf32> to vector<4x64xf32>
    %89 = vector.extract_strided_slice %9 {offsets = [0, 0, 1], sizes = [1, 4, 64], strides = [1, 1, 1]} : vector<8x4x65xf32> to vector<1x4x64xf32>
    %90 = vector.shape_cast %89 : vector<1x4x64xf32> to vector<4x64xf32>
    %91 = vector.extract_strided_slice %9 {offsets = [1, 0, 1], sizes = [1, 4, 64], strides = [1, 1, 1]} : vector<8x4x65xf32> to vector<1x4x64xf32>
    %92 = vector.shape_cast %91 : vector<1x4x64xf32> to vector<4x64xf32>
    %93 = vector.extract_strided_slice %9 {offsets = [2, 0, 1], sizes = [1, 4, 64], strides = [1, 1, 1]} : vector<8x4x65xf32> to vector<1x4x64xf32>
    %94 = vector.shape_cast %93 : vector<1x4x64xf32> to vector<4x64xf32>
    %95 = tpu.concatenate %86, %88, %90, %92, %94 in 0 : vector<4x64xf32>, vector<4x64xf32>, vector<4x64xf32>, vector<4x64xf32>, vector<4x64xf32> -> vector<20x64xf32>
    %cst_45 = arith.constant dense<0.000000e+00> : vector<8x64xf32>
    %96 = tpu.matmul %6, %95, %cst_45 {dimension_numbers = #tpu.dot_dimension_numbers<[1], [0], [0], [1], [0, 0, 1, 1], [], []>} : vector<8x20xf32>, vector<20x64xf32>, vector<8x64xf32> -> vector<8x64xf32>
    %97 = vector.broadcast %7 : vector<8x1xf32> to vector<8x64xf32>
    %98 = arith.addf %96, %97 : vector<8x64xf32>
    %c0_46 = arith.constant 0 : index
    %c3_47 = arith.constant 3 : index
    %c0_48 = arith.constant 0 : index
    %c0_49 = arith.constant 0 : index
    %99 = vector.load %arg10[%c0_46, %c3_47, %c0_48, %c0_49] : memref<1x4x8x64xf32, #tpu.memory_space<vmem>>, vector<1x1x8x64xf32>
    %100 = vector.shape_cast %99 : vector<1x1x8x64xf32> to vector<8x64xf32>
    %101 = vector.shape_cast %98 : vector<8x64xf32> to vector<1x1x8x64xf32>
    tpu.vector_store %arg10[%c0_46, %c3_47, %c0_48, %c0_49], %101 {strides = array<i32>} : memref<1x4x8x64xf32, #tpu.memory_space<vmem>>, vector<1x1x8x64xf32>,
    %cst_50 = arith.constant 0.000000e+00 : f32
    %102 = vector.broadcast %cst_50 : f32 to vector<8x64xf32>
    %103 = arith.cmpf ogt, %98, %102 : vector<8x64xf32>
    %cst_51 = arith.constant 2.000000e-01 : f32
    %104 = vector.broadcast %cst_51 : f32 to vector<8x64xf32>
    %105 = arith.mulf %104, %98 : vector<8x64xf32>
    %106 = arith.select %103, %98, %105 : vector<8x64xi1>, vector<8x64xf32>
    %c1_52 = arith.constant 1 : index
    %c0_53 = arith.constant 0 : index
    %c1_54 = arith.constant 1 : index
    %107 = vector.load %arg14[%c1_52, %c0_53, %c1_54] : memref<4x8x65xf32, #tpu.memory_space<vmem>>, vector<1x8x64xf32>
    %108 = vector.shape_cast %107 : vector<1x8x64xf32> to vector<8x64xf32>
    %109 = vector.shape_cast %106 : vector<8x64xf32> to vector<1x8x64xf32>
    tpu.vector_store %arg14[%c1_52, %c0_53, %c1_54], %109 {strides = array<i32>} : memref<4x8x65xf32, #tpu.memory_space<vmem>>, vector<1x8x64xf32>,
    %c0_55 = arith.constant 0 : index
    %c0_56 = arith.constant 0 : index
    %110 = vector.load %arg4[%c0_55, %c0_56] : memref<16x40xf32, #tpu.memory_space<vmem>>, vector<16x40xf32>
    %c0_57 = arith.constant 0 : index
    %c0_58 = arith.constant 0 : index
    %111 = vector.load %arg5[%c0_57, %c0_58] : memref<16x1xf32, #tpu.memory_space<vmem>>, vector<16x1xf32>
    %c0_59 = arith.constant 0 : index
    %c0_60 = arith.constant 0 : index
    %c0_61 = arith.constant 0 : index
    %112 = vector.load %arg14[%c0_59, %c0_60, %c0_61] : memref<4x8x65xf32, #tpu.memory_space<vmem>>, vector<4x8x65xf32>
    %113 = vector.extract_strided_slice %112 {offsets = [0, 0, 0], sizes = [1, 8, 64], strides = [1, 1, 1]} : vector<4x8x65xf32> to vector<1x8x64xf32>
    %114 = vector.shape_cast %113 : vector<1x8x64xf32> to vector<8x64xf32>
    %115 = vector.extract_strided_slice %112 {offsets = [1, 0, 0], sizes = [1, 8, 64], strides = [1, 1, 1]} : vector<4x8x65xf32> to vector<1x8x64xf32>
    %116 = vector.shape_cast %115 : vector<1x8x64xf32> to vector<8x64xf32>
    %117 = vector.extract_strided_slice %112 {offsets = [2, 0, 0], sizes = [1, 8, 64], strides = [1, 1, 1]} : vector<4x8x65xf32> to vector<1x8x64xf32>
    %118 = vector.shape_cast %117 : vector<1x8x64xf32> to vector<8x64xf32>
    %119 = vector.extract_strided_slice %112 {offsets = [3, 0, 0], sizes = [1, 8, 64], strides = [1, 1, 1]} : vector<4x8x65xf32> to vector<1x8x64xf32>
    %120 = vector.shape_cast %119 : vector<1x8x64xf32> to vector<8x64xf32>
    %121 = vector.extract_strided_slice %112 {offsets = [0, 0, 1], sizes = [1, 8, 64], strides = [1, 1, 1]} : vector<4x8x65xf32> to vector<1x8x64xf32>
    %122 = vector.shape_cast %121 : vector<1x8x64xf32> to vector<8x64xf32>
    %123 = tpu.concatenate %114, %116, %118, %120, %122 in 0 : vector<8x64xf32>, vector<8x64xf32>, vector<8x64xf32>, vector<8x64xf32>, vector<8x64xf32> -> vector<40x64xf32>
    %cst_62 = arith.constant dense<0.000000e+00> : vector<16x64xf32>
    %124 = tpu.matmul %110, %123, %cst_62 {dimension_numbers = #tpu.dot_dimension_numbers<[1], [0], [0], [1], [0, 0, 1, 1], [], []>} : vector<16x40xf32>, vector<40x64xf32>, vector<16x64xf32> -> vector<16x64xf32>
    %125 = vector.broadcast %111 : vector<16x1xf32> to vector<16x64xf32>
    %126 = arith.addf %124, %125 : vector<16x64xf32>
    %c0_63 = arith.constant 0 : index
    %c0_64 = arith.constant 0 : index
    %c0_65 = arith.constant 0 : index
    %c0_66 = arith.constant 0 : index
    %127 = vector.load %arg11[%c0_63, %c0_64, %c0_65, %c0_66] : memref<1x2x16x64xf32, #tpu.memory_space<vmem>>, vector<1x1x16x64xf32>
    %128 = vector.shape_cast %127 : vector<1x1x16x64xf32> to vector<16x64xf32>
    %129 = vector.shape_cast %126 : vector<16x64xf32> to vector<1x1x16x64xf32>
    tpu.vector_store %arg11[%c0_63, %c0_64, %c0_65, %c0_66], %129 {strides = array<i32>} : memref<1x2x16x64xf32, #tpu.memory_space<vmem>>, vector<1x1x16x64xf32>,
    %cst_67 = arith.constant 0.000000e+00 : f32
    %130 = vector.broadcast %cst_67 : f32 to vector<16x64xf32>
    %131 = arith.cmpf ogt, %126, %130 : vector<16x64xf32>
    %cst_68 = arith.constant 2.000000e-01 : f32
    %132 = vector.broadcast %cst_68 : f32 to vector<16x64xf32>
    %133 = arith.mulf %132, %126 : vector<16x64xf32>
    %134 = arith.select %131, %126, %133 : vector<16x64xi1>, vector<16x64xf32>
    %c0_69 = arith.constant 0 : index
    %c0_70 = arith.constant 0 : index
    %c1_71 = arith.constant 1 : index
    %135 = vector.load %arg15[%c0_69, %c0_70, %c1_71] : memref<2x16x66xf32, #tpu.memory_space<vmem>>, vector<1x16x64xf32>
    %136 = vector.shape_cast %135 : vector<1x16x64xf32> to vector<16x64xf32>
    %137 = vector.shape_cast %134 : vector<16x64xf32> to vector<1x16x64xf32>
    tpu.vector_store %arg15[%c0_69, %c0_70, %c1_71], %137 {strides = array<i32>} : memref<2x16x66xf32, #tpu.memory_space<vmem>>, vector<1x16x64xf32>,
    %138 = vector.extract_strided_slice %112 {offsets = [2, 0, 0], sizes = [1, 8, 64], strides = [1, 1, 1]} : vector<4x8x65xf32> to vector<1x8x64xf32>
    %139 = vector.shape_cast %138 : vector<1x8x64xf32> to vector<8x64xf32>
    %140 = vector.extract_strided_slice %112 {offsets = [3, 0, 0], sizes = [1, 8, 64], strides = [1, 1, 1]} : vector<4x8x65xf32> to vector<1x8x64xf32>
    %141 = vector.shape_cast %140 : vector<1x8x64xf32> to vector<8x64xf32>
    %142 = vector.extract_strided_slice %112 {offsets = [0, 0, 1], sizes = [1, 8, 64], strides = [1, 1, 1]} : vector<4x8x65xf32> to vector<1x8x64xf32>
    %143 = vector.shape_cast %142 : vector<1x8x64xf32> to vector<8x64xf32>
    %144 = vector.extract_strided_slice %112 {offsets = [1, 0, 1], sizes = [1, 8, 64], strides = [1, 1, 1]} : vector<4x8x65xf32> to vector<1x8x64xf32>
    %145 = vector.shape_cast %144 : vector<1x8x64xf32> to vector<8x64xf32>
    %146 = vector.extract_strided_slice %112 {offsets = [2, 0, 1], sizes = [1, 8, 64], strides = [1, 1, 1]} : vector<4x8x65xf32> to vector<1x8x64xf32>
    %147 = vector.shape_cast %146 : vector<1x8x64xf32> to vector<8x64xf32>
    %148 = tpu.concatenate %139, %141, %143, %145, %147 in 0 : vector<8x64xf32>, vector<8x64xf32>, vector<8x64xf32>, vector<8x64xf32>, vector<8x64xf32> -> vector<40x64xf32>
    %cst_72 = arith.constant dense<0.000000e+00> : vector<16x64xf32>
    %149 = tpu.matmul %110, %148, %cst_72 {dimension_numbers = #tpu.dot_dimension_numbers<[1], [0], [0], [1], [0, 0, 1, 1], [], []>} : vector<16x40xf32>, vector<40x64xf32>, vector<16x64xf32> -> vector<16x64xf32>
    %150 = vector.broadcast %111 : vector<16x1xf32> to vector<16x64xf32>
    %151 = arith.addf %149, %150 : vector<16x64xf32>
    %c0_73 = arith.constant 0 : index
    %c1_74 = arith.constant 1 : index
    %c0_75 = arith.constant 0 : index
    %c0_76 = arith.constant 0 : index
    %152 = vector.load %arg11[%c0_73, %c1_74, %c0_75, %c0_76] : memref<1x2x16x64xf32, #tpu.memory_space<vmem>>, vector<1x1x16x64xf32>
    %153 = vector.shape_cast %152 : vector<1x1x16x64xf32> to vector<16x64xf32>
    %154 = vector.shape_cast %151 : vector<16x64xf32> to vector<1x1x16x64xf32>
    tpu.vector_store %arg11[%c0_73, %c1_74, %c0_75, %c0_76], %154 {strides = array<i32>} : memref<1x2x16x64xf32, #tpu.memory_space<vmem>>, vector<1x1x16x64xf32>,
    %cst_77 = arith.constant 0.000000e+00 : f32
    %155 = vector.broadcast %cst_77 : f32 to vector<16x64xf32>
    %156 = arith.cmpf ogt, %151, %155 : vector<16x64xf32>
    %cst_78 = arith.constant 2.000000e-01 : f32
    %157 = vector.broadcast %cst_78 : f32 to vector<16x64xf32>
    %158 = arith.mulf %157, %151 : vector<16x64xf32>
    %159 = arith.select %156, %151, %158 : vector<16x64xi1>, vector<16x64xf32>
    %c1_79 = arith.constant 1 : index
    %c0_80 = arith.constant 0 : index
    %c1_81 = arith.constant 1 : index
    %160 = vector.load %arg15[%c1_79, %c0_80, %c1_81] : memref<2x16x66xf32, #tpu.memory_space<vmem>>, vector<1x16x64xf32>
    %161 = vector.shape_cast %160 : vector<1x16x64xf32> to vector<16x64xf32>
    %162 = vector.shape_cast %159 : vector<16x64xf32> to vector<1x16x64xf32>
    tpu.vector_store %arg15[%c1_79, %c0_80, %c1_81], %162 {strides = array<i32>} : memref<2x16x66xf32, #tpu.memory_space<vmem>>, vector<1x16x64xf32>,
    %c0_82 = arith.constant 0 : index
    %c0_83 = arith.constant 0 : index
    %163 = vector.load %arg6[%c0_82, %c0_83] : memref<16x80xf32, #tpu.memory_space<vmem>>, vector<16x80xf32>
    %c0_84 = arith.constant 0 : index
    %c0_85 = arith.constant 0 : index
    %164 = vector.load %arg7[%c0_84, %c0_85] : memref<16x1xf32, #tpu.memory_space<vmem>>, vector<16x1xf32>
    %c0_86 = arith.constant 0 : index
    %c0_87 = arith.constant 0 : index
    %c0_88 = arith.constant 0 : index
    %165 = vector.load %arg15[%c0_86, %c0_87, %c0_88] : memref<2x16x66xf32, #tpu.memory_space<vmem>>, vector<2x16x66xf32>
    %166 = vector.extract_strided_slice %165 {offsets = [0, 0, 0], sizes = [1, 16, 64], strides = [1, 1, 1]} : vector<2x16x66xf32> to vector<1x16x64xf32>
    %167 = vector.shape_cast %166 : vector<1x16x64xf32> to vector<16x64xf32>
    %168 = vector.extract_strided_slice %165 {offsets = [1, 0, 0], sizes = [1, 16, 64], strides = [1, 1, 1]} : vector<2x16x66xf32> to vector<1x16x64xf32>
    %169 = vector.shape_cast %168 : vector<1x16x64xf32> to vector<16x64xf32>
    %170 = vector.extract_strided_slice %165 {offsets = [0, 0, 1], sizes = [1, 16, 64], strides = [1, 1, 1]} : vector<2x16x66xf32> to vector<1x16x64xf32>
    %171 = vector.shape_cast %170 : vector<1x16x64xf32> to vector<16x64xf32>
    %172 = vector.extract_strided_slice %165 {offsets = [1, 0, 1], sizes = [1, 16, 64], strides = [1, 1, 1]} : vector<2x16x66xf32> to vector<1x16x64xf32>
    %173 = vector.shape_cast %172 : vector<1x16x64xf32> to vector<16x64xf32>
    %174 = vector.extract_strided_slice %165 {offsets = [0, 0, 2], sizes = [1, 16, 64], strides = [1, 1, 1]} : vector<2x16x66xf32> to vector<1x16x64xf32>
    %175 = vector.shape_cast %174 : vector<1x16x64xf32> to vector<16x64xf32>
    %176 = tpu.concatenate %167, %169, %171, %173, %175 in 0 : vector<16x64xf32>, vector<16x64xf32>, vector<16x64xf32>, vector<16x64xf32>, vector<16x64xf32> -> vector<80x64xf32>
    %cst_89 = arith.constant dense<0.000000e+00> : vector<16x64xf32>
    %177 = tpu.matmul %163, %176, %cst_89 {dimension_numbers = #tpu.dot_dimension_numbers<[1], [0], [0], [1], [0, 0, 1, 1], [], []>} : vector<16x80xf32>, vector<80x64xf32>, vector<16x64xf32> -> vector<16x64xf32>
    %178 = vector.broadcast %164 : vector<16x1xf32> to vector<16x64xf32>
    %179 = arith.addf %177, %178 : vector<16x64xf32>
    %c0_90 = arith.constant 0 : index
    %c0_91 = arith.constant 0 : index
    %c0_92 = arith.constant 0 : index
    %c0_93 = arith.constant 0 : index
    %180 = vector.load %arg12[%c0_90, %c0_91, %c0_92, %c0_93] : memref<1x1x16x64xf32, #tpu.memory_space<vmem>>, vector<1x1x16x64xf32>
    %181 = vector.shape_cast %180 : vector<1x1x16x64xf32> to vector<16x64xf32>
    %182 = vector.shape_cast %179 : vector<16x64xf32> to vector<1x1x16x64xf32>
    tpu.vector_store %arg12[%c0_90, %c0_91, %c0_92, %c0_93], %182 {strides = array<i32>} : memref<1x1x16x64xf32, #tpu.memory_space<vmem>>, vector<1x1x16x64xf32>,
    %cst_94 = arith.constant 0.000000e+00 : f32
    %183 = vector.broadcast %cst_94 : f32 to vector<16x64xf32>
    %184 = arith.cmpf ogt, %179, %183 : vector<16x64xf32>
    %cst_95 = arith.constant 2.000000e-01 : f32
    %185 = vector.broadcast %cst_95 : f32 to vector<16x64xf32>
    %186 = arith.mulf %185, %179 : vector<16x64xf32>
    %187 = arith.select %184, %179, %186 : vector<16x64xi1>, vector<16x64xf32>
    %c0_96 = arith.constant 0 : index
    %c0_97 = arith.constant 0 : index
    %c0_98 = arith.constant 0 : index
    %188 = vector.load %arg16[%c0_96, %c0_97, %c0_98] : memref<1x16x64xf32, #tpu.memory_space<vmem>>, vector<1x16x64xf32>
    %189 = vector.shape_cast %188 : vector<1x16x64xf32> to vector<16x64xf32>
    %190 = vector.shape_cast %187 : vector<16x64xf32> to vector<1x16x64xf32>
    tpu.vector_store %arg16[%c0_96, %c0_97, %c0_98], %190 {strides = array<i32>} : memref<1x16x64xf32, #tpu.memory_space<vmem>>, vector<1x16x64xf32>,
    %c0_99 = arith.constant 0 : index
    %c0_100 = arith.constant 0 : index
    %191 = vector.load %arg8[%c0_99, %c0_100] : memref<4x16xf32, #tpu.memory_space<vmem>>, vector<4x16xf32>
    %c0_101 = arith.constant 0 : index
    %c0_102 = arith.constant 0 : index
    %192 = vector.load %arg9[%c0_101, %c0_102] : memref<4x1xf32, #tpu.memory_space<vmem>>, vector<4x1xf32>
    %c0_103 = arith.constant 0 : index
    %c0_104 = arith.constant 0 : index
    %c0_105 = arith.constant 0 : index
    %193 = vector.load %arg16[%c0_103, %c0_104, %c0_105] : memref<1x16x64xf32, #tpu.memory_space<vmem>>, vector<1x16x64xf32>
    %194 = vector.shape_cast %193 : vector<1x16x64xf32> to vector<16x64xf32>
    %cst_106 = arith.constant dense<0.000000e+00> : vector<4x64xf32>
    %195 = tpu.matmul %191, %194, %cst_106 {dimension_numbers = #tpu.dot_dimension_numbers<[1], [0], [0], [1], [0, 0, 1, 1], [], []>} : vector<4x16xf32>, vector<16x64xf32>, vector<4x64xf32> -> vector<4x64xf32>
    %196 = vector.broadcast %192 : vector<4x1xf32> to vector<4x64xf32>
    %197 = arith.addf %195, %196 : vector<4x64xf32>
    %c0_107 = arith.constant 0 : index
    %c0_108 = arith.constant 0 : index
    %c0_109 = arith.constant 0 : index
    %c0_110 = arith.constant 0 : index
    %198 = vector.load %arg13[%c0_107, %c0_108, %c0_109, %c0_110] : memref<1x1x4x64xf32, #tpu.memory_space<vmem>>, vector<1x1x4x64xf32>
    %199 = vector.shape_cast %198 : vector<1x1x4x64xf32> to vector<4x64xf32>
    %200 = vector.shape_cast %197 : vector<4x64xf32> to vector<1x1x4x64xf32>
    tpu.vector_store %arg13[%c0_107, %c0_108, %c0_109, %c0_110], %200 {strides = array<i32>} : memref<1x1x4x64xf32, #tpu.memory_space<vmem>>, vector<1x1x4x64xf32>,
    return
  }
  func.func @transform_0(%arg0: i32) -> (i32, i32, i32, i32) {
    %c0_i32 = arith.constant 0 : i32
    %c0_i32_0 = arith.constant 0 : i32
    %c0_i32_1 = arith.constant 0 : i32
    %c0_i32_2 = arith.constant 0 : i32
    return %arg0, %c0_i32, %c0_i32_0, %c0_i32_1 : i32, i32, i32, i32
  }
  func.func @transform_1(%arg0: i32) -> (i32, i32) {
    %c0_i32 = arith.constant 0 : i32
    %c0_i32_0 = arith.constant 0 : i32
    %c0_i32_1 = arith.constant 0 : i32
    return %c0_i32, %c0_i32_0 : i32, i32
  }
  func.func @transform_2(%arg0: i32) -> (i32, i32) {
    %c0_i32 = arith.constant 0 : i32
    %c0_i32_0 = arith.constant 0 : i32
    %c0_i32_1 = arith.constant 0 : i32
    return %c0_i32, %c0_i32_0 : i32, i32
  }
  func.func @transform_3(%arg0: i32) -> (i32, i32) {
    %c0_i32 = arith.constant 0 : i32
    %c0_i32_0 = arith.constant 0 : i32
    %c0_i32_1 = arith.constant 0 : i32
    return %c0_i32, %c0_i32_0 : i32, i32
  }
  func.func @transform_4(%arg0: i32) -> (i32, i32) {
    %c0_i32 = arith.constant 0 : i32
    %c0_i32_0 = arith.constant 0 : i32
    %c0_i32_1 = arith.constant 0 : i32
    return %c0_i32, %c0_i32_0 : i32, i32
  }
  func.func @transform_5(%arg0: i32) -> (i32, i32) {
    %c0_i32 = arith.constant 0 : i32
    %c0_i32_0 = arith.constant 0 : i32
    %c0_i32_1 = arith.constant 0 : i32
    return %c0_i32, %c0_i32_0 : i32, i32
  }
  func.func @transform_6(%arg0: i32) -> (i32, i32) {
    %c0_i32 = arith.constant 0 : i32
    %c0_i32_0 = arith.constant 0 : i32
    %c0_i32_1 = arith.constant 0 : i32
    return %c0_i32, %c0_i32_0 : i32, i32
  }
  func.func @transform_7(%arg0: i32) -> (i32, i32) {
    %c0_i32 = arith.constant 0 : i32
    %c0_i32_0 = arith.constant 0 : i32
    %c0_i32_1 = arith.constant 0 : i32
    return %c0_i32, %c0_i32_0 : i32, i32
  }
  func.func @transform_8(%arg0: i32) -> (i32, i32) {
    %c0_i32 = arith.constant 0 : i32
    %c0_i32_0 = arith.constant 0 : i32
    %c0_i32_1 = arith.constant 0 : i32
    return %c0_i32, %c0_i32_0 : i32, i32
  }
  func.func @transform_9(%arg0: i32) -> (i32, i32, i32, i32) {
    %c0_i32 = arith.constant 0 : i32
    %c0_i32_0 = arith.constant 0 : i32
    %c0_i32_1 = arith.constant 0 : i32
    %c0_i32_2 = arith.constant 0 : i32
    return %arg0, %c0_i32, %c0_i32_0, %c0_i32_1 : i32, i32, i32, i32
  }
  func.func @transform_10(%arg0: i32) -> (i32, i32, i32, i32) {
    %c0_i32 = arith.constant 0 : i32
    %c0_i32_0 = arith.constant 0 : i32
    %c0_i32_1 = arith.constant 0 : i32
    %c0_i32_2 = arith.constant 0 : i32
    return %arg0, %c0_i32, %c0_i32_0, %c0_i32_1 : i32, i32, i32, i32
  }
  func.func @transform_11(%arg0: i32) -> (i32, i32, i32, i32) {
    %c0_i32 = arith.constant 0 : i32
    %c0_i32_0 = arith.constant 0 : i32
    %c0_i32_1 = arith.constant 0 : i32
    %c0_i32_2 = arith.constant 0 : i32
    return %arg0, %c0_i32, %c0_i32_0, %c0_i32_1 : i32, i32, i32, i32
  }
  func.func @transform_12(%arg0: i32) -> (i32, i32, i32, i32) {
    %c0_i32 = arith.constant 0 : i32
    %c0_i32_0 = arith.constant 0 : i32
    %c0_i32_1 = arith.constant 0 : i32
    %c0_i32_2 = arith.constant 0 : i32
    return %arg0, %c0_i32, %c0_i32_0, %c0_i32_1 : i32, i32, i32, i32
  }
}

</mosaic_0001>

<bundles_post_ra>
// kernel: tpu_custom_call.1
= control target key start
LH: loop header
LB: loop body
LE: loop exit
PB: predicated region body
PF: predicated region fallthrough
CT: control target
= control target key end

     0   :  { %s2536_s0 = inlined_call_operand.hbm [shape: f32[2,8,4,65], index: 0, kind: input, shape index: {}]   ;;  %s2537_s1 = inlined_call_operand.vmem [shape: f32[8,20], index: 1, kind: input, shape index: {}]   ;;  %s2538_s2 = inlined_call_operand.vmem [shape: f32[8,1], index: 2, kind: input, shape index: {}]   ;;  %s2539_s3 = inlined_call_operand.vmem [shape: f32[16,40], index: 3, kind: input, shape index: {}]   ;;  %s2540_s4 = inlined_call_operand.vmem [shape: f32[16,1], index: 4, kind: input, shape index: {}]   ;;  %s2541_s5 = inlined_call_operand.vmem [shape: f32[16,80], index: 5, kind: input, shape index: {}]   ;;  %s2542_s6 = inlined_call_operand.vmem [shape: f32[16,1], index: 6, kind: input, shape index: {}]   ;;  %s2543_s7 = inlined_call_operand.vmem [shape: f32[4,16], index: 7, kind: input, shape index: {}]   ;;  %s2544_s8 = inlined_call_operand.vmem [shape: f32[4,1], index: 8, kind: input, shape index: {}]   ;;  %s2545_s9 = inlined_call_operand.hbm [shape: f32[2,4,8,64], index: 9, kind: output, shape index: {0}]   ;;  %s2546_s10 = inlined_call_operand.hbm [shape: f32[2,2,16,64], index: 10, kind: output, shape index: {1}]   ;;  %s2547_s11 = inlined_call_operand.hbm [shape: f32[2,1,16,64], index: 11, kind: output, shape index: {2}]   ;;  %s2548_s12 = inlined_call_operand.hbm [shape: f32[2,1,4,64], index: 12, kind: output, shape index: {3}]  }
   0x1   :  { %2555 = sst [smem:[#allocation21_spill]] %s2536_s0 }
   0x2   :  { %2556 = sst [smem:[#allocation22_spill]] %s2537_s1 }
   0x3   :  { %2557 = sst [smem:[#allocation23_spill]] %s2538_s2 }
   0x4   :  { %2558 = sst [smem:[#allocation24_spill]] %s2539_s3 }
   0x5   :  { %2559 = sst [smem:[#allocation25_spill]] %s2540_s4 }
   0x6   :  { %2560 = sst [smem:[#allocation26_spill]] %s2541_s5 }
   0x7   :  { %18 = vsyncpa [#allocation6], 0 }
   0x8   :  { %20 = vsyncpa [#allocation6 + $0x1], 0 }
   0x9   :  { %21 = vsyncpa [#allocation7], 0 }
   0xa   :  { %23 = vsyncpa [#allocation7 + $0x1], 0 }
   0xb   :  { %24 = vsyncpa [#allocation10], 0 }
   0xc   :  { %26 = vsyncpa [#allocation10 + $0x1], 0 }
   0xd   :  { %27 = vsyncpa [#allocation13], 0 }
   0xe   :  { %29 = vsyncpa [#allocation13 + $0x1], 0  ;;  %s2124_s21 = smov 0   ;;  %s2126_s22 = smov 0  }
   0xf   :  { %s2128_s23 = smov 0   ;;  %s2130_s24 = smov 0  }
  0x10 LB: > { %2561 = sst [smem:[#allocation18_spill]] %s2037_s23  ;;  %s2145_s25 = sadd.s32 4294967295, %s2041_s24   ;;  %s2041_s24 = sphi %s2130_s24, %s2580_s24   ;;  %s2037_s23 = sphi %s2128_s23, %s2585_s23   ;;  %s2033_s22 = sphi %s2126_s22, %s2584_s22   ;;  %s2029_s21 = sphi %s2124_s21, %s2583_s21  }
  0x11   : > { %s2549_s26 = sadd.s32 4294967294, %s2041_s24   ;;  %s2149_s27 = sadd.s32 1, %s2041_s24  }
  0x12   : > { %2562 = sst [smem:[#allocation19_spill]] %s2149_s27  ;;  %s42_s28 = sadd.s32 1, %s2037_s23 }
  0x13   : > { %s39_s29 = ssub.s32 %s2041_s24, %s2149_s27  ;;  %p49_p0 = scmp.ne.s32.totalorder %s2037_s23, %s2033_s22 }
  0x14   : > { %p40_p1 = scmp.eq.s32.totalorder %s39_s29, 0  ;;  %p50_p2 = scmp.eq.s32.totalorder %s2041_s24, 0 }
  0x15   : > { %p55_p3 = scmp.ne.s32.totalorder %s2033_s22, %s2029_s21  ;;  %p56_p4 = scmp.eq.s32.totalorder %s2145_s25, 0 }
  0x16   : > { %s2161_s30 = scalar_select %p40_p1, %s2037_s23, %s42_s28  }
  0x17   : > { %p2163_p5 = por %p50_p2, %p49_p0  ;;  %p2167_p6 = por %p56_p4, %p55_p3 }
  0x18   : > { %2563 = sst [smem:[#allocation20_spill]] %s2161_s30  ;;  %p247_p7 = scmp.eq.s32.totalorder %s2145_s25, 1 }
  0x19   : > { %p253_p8 = scmp.eq.s32.totalorder %s2549_s26, 1  ;;  %p1791_p10 = scmp.lt.s32.totalorder %s2041_s24, 2 }
  0x1a   : > { %p2176_p11 = por %p247_p7, %p49_p0  ;;  %s375_s17 = sand.u32 1, %s2037_s23  }
  0x1b   : > { %p2180_p12 = por %p253_p8, %p55_p3  ;;  %s1572_s18 = sshll.u32 %s2041_s24, 9 }
  0x1c   : > { %s2566_s15 = scalar_select %p2176_p11, 1, 0 }
  0x1d   : > { %s2567_s16 = scalar_select %p2180_p12, 1, 0 }
  0x1e   : > { %s1530_s19 = sshll.u32 %s375_s17, 5  ;;  %s2568_s0 = sld [smem:[#allocation21_spill]] }
  0x1f   : > { %s379_s26 = scalar_lea.vmem [#allocation5], %s1530_s19  ;;  %p2193_p13 = pnand %p1791_p10, %p2163_p5 }
  0x20   : > { %s386_s30 = sshll.u32 %s379_s26, 4  ;;  %s2199_s23 = scalar_lea.sflag [#allocation6], %s375_s17  ;;  %s2197_s30 = int_to_ptr.vmem [resolvable:$true] %s386_s30 }
  0x21   : > { %p1855_p1 = pneg %p2193_p13 }
  0x24   : > { %s2189_s29 = scalar_lea.hbm %s2568_s0, %s1572_s18  ;;  %s1858_s18 = scalar_lea.hbm %s2568_s0, 1024 }
  0x25   : > { %s1853_s20 = scalar_lea.hbm %s2189_s29, 512  ;;  %p1859_p4 = scmp.lt.u32.totalorder %s2189_s29, %s2568_s0 }
  0x26   : > { %p1854_p0 = scmp.ne.s32.totalorder %s2189_s29, %s1853_s20  ;;  %p1860_p5 = scmp.lt.u32.totalorder %s1858_s18, %s1853_s20 }
  0x27   : > { %p1862_p8 = scmp.lt.u32.totalorder %s1853_s20, %s2189_s29 }
  0x28   : > { %p1856_p2 = pnand %p1855_p1, %p1854_p0  ;;  %p1861_p7 = por %p1860_p5, %p1859_p4 }
  0x2a   : > { %p1857_p3 = pneg %p1856_p2  ;;  %p1863_p10 = por %p1862_p8, %p1861_p7 }
  0x2c   : > { %p1864_p9 = pnand %p1863_p10, %p1857_p3 }
  0x2e   : > { %1867 = shalt.err (!%p1864_p9)
}
  0x2f   : > { %s1868_s17 = scalar_lea.vmem %s2197_s30, 512  ;;  %s2043_s26 = smov [#allocation5]  }
  0x30   : > { %p1869_p0 = scmp.ne.s32.totalorder %s2197_s30, %s1868_s17  ;;  %s1873_s13 = sshll.u32 %s2043_s26, 4  ;;  %s1874_s13 = int_to_ptr.vmem [resolvable:$false] %s1873_s13 }
  0x31   : > { %s1875_s19 = scalar_lea.vmem %s1874_s13, 1024  ;;  %p1876_p11 = scmp.lt.s32.totalorder %s2197_s30, %s1874_s13 }
  0x32   : > { %p1871_p2 = pnand %p1869_p0, %p1855_p1  ;;  %p1877_p4 = scmp.lt.s32.totalorder %s1875_s19, %s1868_s17 }
  0x34   : > { %p1872_p12 = pneg %p1871_p2  ;;  %p1878_p5 = por %p1877_p4, %p1876_p11 }
  0x36   : > { %p1879_p7 = pnand %p1878_p5, %p1872_p12 }
  0x38   : > { %1882 = shalt.err (!%p1879_p7)
}
  0x39   : > { %s2044_s20 = smov 64   ;;  %s2045_s18 = smov 4  }
  0x3a   : > { %1777 = dma.hbm_to_vmem [thread:$0]  (!%p2193_p13), %s2189_s29, 512, %s2197_s30, %s2199_s23, %s2044_s20, %s2044_s20, %s2045_s18  }
  0x3b   : > { %p1533_p9 = scmp.ge.s32.totalorder %s2041_s24, 1  ;;  %p394_p1 = scmp.lt.s32.totalorder %s2041_s24, 3 }
  0x3d   : > { %p395_p3 = pnand %p1533_p9, %p394_p1 }
  0x3e   : > { %s2230_s28 = sand.u32 (!%p395_p3), 1, %s2033_s22  }
  0x3f   : > { %398 = sbr.rel (%p395_p3) target bundleno = 1593 (0x639), region = 56  ;;  %s2233_s17 = sshll.u32 (!%p395_p3), %s2230_s28, 5 }
  0x40   : > { %s401_s26 = scalar_lea.sflag (!%p395_p3), [#allocation6], %s2230_s28  ;;  %s404_s13 = scalar_lea.vmem (!%p395_p3), [#allocation5], %s2233_s17 }
  0x46   : > { %2012 = dma.done.wait (%p2167_p6), %s401_s26, 512  }
  0x47   : > { %2014 = vsyncadd (%p2167_p6), %s401_s26, 4294966784  ;;  %v2046_v0 = vmov 0.0|0.0   ;;  %vm2047_vm0 = vmmov 0   ;;  %v2048_v1 = vmov 0.0   ;;  %vm489_vm1 = vcmask 1043456   ;;  %s2049_s23 = smov 127  }
  0x48   : > { %1713 = vmatprep.subr.bf16.mxu1 %v2046_v0  ;;  %1627 = vmatprep.mubr.msk.f32.mxu1 %vm2047_vm0, %v2048_v1  ;;  %v475_v2 = vld [vmem:[%s404_s13] sm:$0xf]  ;;  %v476_v3 = vld [vmem:[%s404_s13 + $0x4] sm:$0xf]  ;;  %v477_v4 = vld [vmem:[%s404_s13 + $0x8] sm:$0xf] }
  0x49   : > { %1719 = vmatprep.subr.bf16.mxu0 %v2046_v0  ;;  %1645 = vmatprep.mubr.msk.f32.mxu0 %vm2047_vm0, %v2048_v1  ;;  %v484_v5 = vrot.slane %v476_v3, 4  ;;  %v478_v6 = vld [vmem:[%s404_s13 + $0xc] sm:$0xf]  ;;  %v479_v7 = vld [vmem:[%s404_s13 + $0x10] sm:$0xf]  ;;  %v2050_v10 = vmov 0  }
  0x4a   : > { %668 = vrot.lane.b32.xlu0 %v475_v2, %s2049_s23  ;;  %759 = vrot.lane.b32.xlu1 %v477_v4, %s2049_s23  ;;  %v480_v8 = vld [vmem:[%s404_s13 + $0x14] sm:$0xf]  ;;  %v487_v9 = vrot.slane %v478_v6, 4  ;;  %v481_v13 = vld [vmem:[%s404_s13 + $0x18] sm:$0xf]  ;;  %s2570_s2 = sld [smem:[#allocation23_spill]] }
  0x4b   : > { %1836 = vset.pattern.permute.xlu1 %v2050_v10  ;;  %1837 = vset.pattern.permute.xlu0 %v2050_v10  ;;  %v490_v11 = vsel %vm489_vm1, %v475_v2, %v484_v5  ;;  %v581_v12 = vrot.slane %v480_v8, 4  ;;  %v482_v14 = vld [vmem:[%s404_s13 + $0x1c] sm:$0xf]  ;;  %s2571_s1 = sld [smem:[#allocation22_spill]]  ;;  %vm497_vm2 = vcmask 162816   ;;  %vm460_vm3 = vcmask 531456  }
  0x4c   : > { %v491_v16 = vsel %vm489_vm1, %v477_v4, %v487_v9  ;;  %v665_v17 = vrot.slane %v482_v14, 4  ;;  %vm470_vm4 = vcmask 523264   ;;  %463 = vst.msk [vmem:[#allocation2 + $0x10] sm:$0xff] %vm460_vm3, %v2048_v1  ;;  %461 = vst.msk [vmem:[#allocation2] sm:$0xff] %vm460_vm3, %v2048_v1  ;;  %s2288_s19 = scalar_lea.vmem [#allocation8], %s2233_s17  ;;  %s2051_s20 = smov 1  }
  0x4d   : > { %v1714_v18 = vpack.c.bf16 %v491_v16, %v490_v11  ;;  %v583_v19 = vsel %vm489_vm1, %v479_v7, %v581_v12  ;;  %462 = vst.msk [vmem:[#allocation2 + $0x8] sm:$0xff] %vm460_vm3, %v2048_v1  ;;  %464 = vst.msk [vmem:[#allocation2 + $0x18] sm:$0xff] %vm460_vm3, %v2048_v1  ;;  %s2572_s3 = sld [smem:[#allocation24_spill]]  ;;  %vm867_vm9 = vcmask 326656   ;;  %vm752_vm10 = vcmask 531464   ;;  %s2573_s4 = sld [smem:[#allocation25_spill]] }
  0x4e   : > { %755 = vrot.lane.b32.xlu0 %v484_v5, %s2049_s23  ;;  %v670_v20 = vsel %vm489_vm1, %v481_v13, %v665_v17  ;;  %v1717_v22 = vpack.c.bf16 %v583_v19, %v491_v16  ;;  %471 = vst.msk [vmem:[#allocation4] sm:$0xff] %vm470_vm4, %v2048_v1  ;;  %472 = vst.msk [vmem:[#allocation4 + $0x8] sm:$0xff] %vm470_vm4, %v2048_v1  ;;  %vm465_vm11 = vcmask 539648   ;;  %s2331_s26 = scalar_lea.vmem [#allocation9], %s2233_s17  ;;  %s2052_s17 = smov 126   ;;  %vm1211_vm3 = vcmask 130048  }
  0x4f   : > { %1715 = vmatpush3.bf16.msra.mxu1 %v1714_v18  ;;  %v1720_v21 = vpack.c.bf16 %v670_v20, %v583_v19  ;;  %467 = vst.msk [vmem:[#allocation3 + $0x8] sm:$0xff] %vm465_vm11, %v2048_v1  ;;  %466 = vst.msk [vmem:[#allocation3] sm:$0xff] %vm465_vm11, %v2048_v1  ;;  %s2574_s5 = sld [smem:[#allocation26_spill]]  ;;  %s1537_s13 = sshll.u32 %s2230_s28, 4 }
  0x50   : > { %v474_v15 = vld [vmem:[%s2570_s2] sm:$0xff]  ;;  %1625 = vmatprep.subr.mxu1 %v2048_v1  ;;  %468 = vst.msk [vmem:[#allocation3 + $0x10] sm:$0xff] %vm465_vm11, %v2048_v1  ;;  %469 = vst.msk [vmem:[#allocation3 + $0x18] sm:$0xff] %vm465_vm11, %v2048_v1  ;;  %s452_s27 = scalar_lea.vmem [#allocation11], %s1537_s13  ;;  %s1332_s29 = sshll.u32 %s2331_s26, 4  ;;  %s2377_s29 = int_to_ptr.vmem [resolvable:$true] %s1332_s29 }
  0x51   : > { %494 = vperm.xlu1 %1836, %v474_v15   ;;  %v473_v23 = vld [vmem:[%s2571_s1] sm:$0xff]  ;;  %1721 = vmatpush3.bf16.msra.mxu0 %v1720_v21  ;;  %s1348_s18 = sshll.u32 %s452_s27, 4  ;;  %s1883_s14 = scalar_lea.vmem %s2377_s29, 512  ;;  %s2379_s18 = int_to_ptr.vmem [resolvable:$true] %s1348_s18 }
  0x52   : > { %1643 = vmatprep.subr.mxu0 %v2048_v1  ;;  %p1884_p6 = scmp.ne.s32.totalorder %s2377_s29, %s1883_s14  ;;  %p2575_p11 = scmp.ne.s32.totalorder %s2566_s15, 0 }
  0x53   : > { %1626 = vmatpush3.msk.msra.mxu1 %vm489_vm1, %v479_v7  ;;  %v845_v53 = vld [vmem:[%s2572_s3] sm:$0xff]  ;;  %v848_v60 = vld [vmem:[%s2573_s4 + $0x8] sm:$0xff] }
  0x54   : > { %1716 = vmatprep.subr.bf16.mxu1 %v2046_v0  ;;  %1628 = vmatmul.mubr.msk.f32.vlgmr.msra.gmra.mrb[0].mxu1 %vm497_vm2, %v473_v23  ;;  %v847_v59 = vld [vmem:[%s2573_s4] sm:$0xff]  ;;  %v846_v62 = vld [vmem:[%s2572_s3 + $0x8] sm:$0xff]  ;;  %p1885_p12 = pnand %p1884_p6, %p2575_p11 }
  0x55   : > { %1718 = vmatpush3.bf16.msra.mxu1 %v1717_v22  ;;  %1636 = vmatprep.mubr.msk.f32.mxu1 %vm2047_vm0, %v2048_v1 }
  0x56   : > { %1634 = vmatprep.subr.mxu1 %v2048_v1  ;;  %p1886_p13 = pneg %p1885_p12 }
  0x59   : > { %1635 = vmatpush3.msk.msra.mxu1 %vm489_vm1, %v481_v13 }
  0x5a   : > { %1637 = vmatmul.mubr.msk.f32.vlgmr.msra.gmra.mrb[2].mxu1 %vm497_vm2, %v473_v23  ;;  %1722 = vmatprep.subr.bf16.mxu1 %v2046_v0 }
  0x5b   : > { %1654 = vmatprep.mubr.msk.f32.mxu1 %vm2047_vm0, %v2048_v1 }
  0xbc   : > { %v669_v24 = vpop.permute.xlu0 %668  ;;  %v760_v28 = vpop.permute.xlu1 %759 }
  0xbd   : > { %1644 = vmatpush3.msk.msra.mxu0 %vm489_vm1, %v669_v24 }
  0xbe   : > { %1646 = vmatmul.mubr.msk.f32.vlgmr.msra.gmra.mrb[0].mxu0 %vm497_vm2, %v473_v23 }
  0xbf   : > { %1667 = vmatprep.mubr.msk.f32.mxu0 %vm867_vm9, %v845_v53 }
  0xc0   : > { %v756_v25 = vpop.permute.xlu0 %755 }
  0xc1   : > { %v761_v26 = vsel %vm489_vm1, %v669_v24, %v756_v25 }
  0xc2   : > { %v1723_v27 = vpack.c.bf16 %v761_v26, %v670_v20 }
  0xc4   : > { %1724 = vmatpush3.bf16.msra.mxu1 %v1723_v27 }
  0xc5   : > { %1652 = vmatprep.subr.mxu1 %v2048_v1 }
  0xc8   : > { %1653 = vmatpush3.msk.msra.mxu1 %vm489_vm1, %v760_v28  ;;  %v1073_v28 = vld [vmem:[%s2542_s6 + $0x8] sm:$0xff] }
  0xc9   : > { %1655 = vmatmul.mubr.msk.f32.vlgmr.msra.gmra.mrb[4].mxu1 %vm497_vm2, %v473_v23 }
  0xca   : > { %1680 = vmatprep.mubr.msk.f32.mxu1 %vm867_vm9, %v845_v53 }
  0xd0   : > { %v495_v29 = vpop.permute.xlu1 %494 }
 0x127   : > { %v570_v30 = vpop.f32.mrb[0].mxu1 }
 0x128   : > { %v1629_v31 = vpop.f32.mrb[1].mxu1  ;;  %v571_v32 = vadd.f32 %v570_v30, %v495_v29  ;;  %v1070_v30 = vld [vmem:[%s2574_s5] sm:$0xff] }
 0x12a   : > { %574 = vst.msk [vmem:[%s2288_s19] sm:$0xff] %vm470_vm4, %v571_v32  ;;  %vm575_vm5 = vcmp.gt.f32.partialorder %v571_v32, 0.0  ;;  %v576_v33 = vmul.f32 0.2, %v571_v32 }
 0x12c   : > { %v577_v34 = vsel %vm575_vm5, %v571_v32, %v576_v33 }
 0x12d   : > { %579 = vst.msk [vmem:[#allocation2 + $0x10] sm:$0xff] %vm470_vm4, %v577_v34  ;;  %v653_v35 = vpop.f32.mrb[2].mxu1  ;;  %v1072_v34 = vld [vmem:[%s2542_s6] sm:$0xff] }
 0x12e   : > { %v654_v36 = vadd.f32 %v653_v35, %v495_v29  ;;  %v1638_v37 = vpop.f32.mrb[3].mxu1  ;;  %v1203_v35 = vld [vmem:[%s2544_s8] sm:$0xf] }
 0x130   : > { %1543 = vst.msk [vmem:[%s2288_s19 + $0x8] sm:$0xff] %vm470_vm4, %v654_v36  ;;  %vm659_vm6 = vcmp.gt.f32.partialorder %v654_v36, 0.0  ;;  %v660_v38 = vmul.f32 0.2, %v654_v36 }
 0x132   : > { %v661_v39 = vsel %vm659_vm6, %v654_v36, %v660_v38 }
 0x133   : > { %663 = vst.msk [vmem:[#allocation2 + $0x18] sm:$0xff] %vm470_vm4, %v661_v39 }
 0x134   : > { %v851_v40 = vld [vmem:[#allocation2 + $0x10] sm:$0xff] }
 0x13a   : > { %v852_v41 = vld [vmem:[#allocation2 + $0x18] sm:$0xff] }
 0x13b   : > { %v1729_v42 = vpack.c.bf16 %v852_v41, %v851_v40 }
 0x13d   : > { %1734 = vmatprep.subr.bf16.mxu1 %v1729_v42 }
 0x13e   : > { %1736 = vmatpush3.bf16.msra.mxu1 %v1729_v42 }
 0x191   : > { %v739_v43 = vpop.f32.mrb[0].mxu0 }
 0x192   : > { %v740_v44 = vadd.f32 %v739_v43, %v495_v29  ;;  %v1647_v45 = vpop.f32.mrb[1].mxu0 }
 0x194   : > { %1546 = vst.msk [vmem:[%s2288_s19 + $0x10] sm:$0xff] %vm470_vm4, %v740_v44  ;;  %vm745_vm7 = vcmp.gt.f32.partialorder %v740_v44, 0.0  ;;  %v746_v46 = vmul.f32 0.2, %v740_v44 }
 0x196   : > { %v747_v47 = vsel %vm745_vm7, %v740_v44, %v746_v46 }
 0x197   : > { %749 = vrot.lane.b32.xlu0 %v747_v47, %s2051_s20 }
 0x19c   : > { %v830_v48 = vpop.f32.mrb[4].mxu1 }
 0x19d   : > { %v831_v49 = vadd.f32 %v830_v48, %v495_v29  ;;  %v1656_v50 = vpop.f32.mrb[5].mxu1  ;;  %v1071_v48 = vld [vmem:[%s2574_s5 + $0x8] sm:$0xff] }
 0x19f   : > { %1549 = vst.msk [vmem:[%s2288_s19 + $0x18] sm:$0xff] %vm470_vm4, %v831_v49  ;;  %vm836_vm8 = vcmp.gt.f32.partialorder %v831_v49, 0.0  ;;  %v837_v51 = vmul.f32 0.2, %v831_v49 }
 0x1a1   : > { %v838_v52 = vsel %vm836_vm8, %v831_v49, %v837_v51 }
 0x1a2   : > { %840 = vrot.lane.b32.xlu1 %v838_v52, %s2051_s20 }
 0x209   : > { %v750_v54 = vpop.permute.xlu0 %749 }
 0x20a   : > { %753 = vst.msk [vmem:[#allocation2] sm:$0xff] %vm752_vm10, %v750_v54 }
 0x211   : > { %v849_v55 = vld [vmem:[#allocation2] sm:$0xff] }
 0x212   : > { %854 = vrot.lane.b32.xlu0 %v849_v55, %s2049_s23 }
 0x214   : > { %v841_v56 = vpop.permute.xlu1 %840 }
 0x215   : > { %844 = vst.msk [vmem:[#allocation2 + $0x8] sm:$0xff] %vm752_vm10, %v841_v56 }
 0x216   : > { %972 = vrot.lane.b32.xlu0 %v851_v40, %s2049_s23 }
 0x21a   : > { %864 = vperm.xlu0 %1837, %v848_v60  }
 0x21c   : > { %v850_v57 = vld [vmem:[#allocation2 + $0x8] sm:$0xff] }
 0x21d   : > { %968 = vrot.lane.b32.xlu1 %v850_v57, %s2049_s23  ;;  %v1725_v58 = vpack.c.bf16 %v850_v57, %v849_v55 }
 0x21f   : > { %1726 = vmatprep.subr.bf16.mxu0 %v1725_v58 }
 0x220   : > { %1728 = vmatpush3.bf16.msra.mxu0 %v1725_v58 }
 0x221   : > { %859 = vperm.xlu1 %1836, %v847_v59   ;;  %1730 = vmatprep.subr.bf16.mxu0 %v1729_v42 }
 0x224   : > { %1732 = vmatpush3.bf16.msra.mxu0 %v1729_v42 }
 0x284   : > { %v855_v61 = vpop.permute.xlu0 %854 }
 0x285   : > { %1665 = vmatprep.subr.mxu0 %v855_v61 }
 0x286   : > { %1666 = vmatpush3.msra.mxu0 %v855_v61 }
 0x287   : > { %1668 = vmatmul.mubr.msk.f32.vlgmr.msra.gmra.mrb[2].mxu0 %vm867_vm9, %v846_v62 }
 0x288   : > { %v973_v3 = vpop.permute.xlu0 %972 }
 0x28f   : > { %v969_v63 = vpop.permute.xlu1 %968 }
 0x290   : > { %v1737_v2 = vpack.c.bf16 %v969_v63, %v855_v61 }
 0x292   : > { %1738 = vmatprep.subr.bf16.mxu1 %v1737_v2 }
 0x293   : > { %1740 = vmatpush3.bf16.msra.mxu1 %v1737_v2 }
 0x294   : > { %1678 = vmatprep.subr.mxu1 %v973_v3 }
 0x297   : > { %1679 = vmatpush3.msra.mxu1 %v973_v3 }
 0x298   : > { %1681 = vmatmul.mubr.msk.f32.vlgmr.msra.gmra.mrb[6].mxu1 %vm867_vm9, %v846_v62  ;;  %1761 = vmatprep.subr.bf16.mxu1 %v2046_v0  ;;  %v1202_v62 = vld [vmem:[%s2543_s7] sm:$0xf] }
 0x299   : > { %1710 = vmatprep.mubr.msk.f32.mxu1 %vm2047_vm0, %v2048_v1  ;;  %v865_v4 = vpop.permute.xlu0 %864  ;;  %vm1110_vm0 = vcmask 654336  }
 0x29a   : > { %1703 = vmatprep.mubr.msk.f32.mxu0 %vm1110_vm0, %v1070_v30 }
 0x2a0   : > { %v860_v6 = vpop.permute.xlu1 %859 }
 0x35a   : > { %v1669_v5 = vpop.f32.mrb[2].mxu0 }
 0x35b   : > { %v946_v7 = vadd.f32 %v1669_v5, %v865_v4  ;;  %v940_v8 = vpop.f32.mrb[3].mxu0 }
 0x35c   : > { %v941_v9 = vadd.f32 %v940_v8, %v860_v6 }
 0x35d   : > { %950 = vst.msk [vmem:[%s2331_s26 + $0x8] sm:$0xff] %vm470_vm4, %v946_v7  ;;  %vm952_vm12 = vcmp.gt.f32.partialorder %v946_v7, 0.0  ;;  %v954_v0 = vmul.f32 0.2, %v946_v7 }
 0x35e   : > { %949 = vst.msk [vmem:[%s2331_s26] sm:$0xff] %vm470_vm4, %v941_v9  ;;  %v953_v1 = vmul.f32 0.2, %v941_v9  ;;  %vm951_vm13 = vcmp.gt.f32.partialorder %v941_v9, 0.0 }
 0x35f   : > { %v956_v10 = vsel %vm952_vm12, %v946_v7, %v954_v0 }
 0x360   : > { %961 = vrot.lane.b32.xlu1 %v956_v10, %s2051_s20  ;;  %v955_v11 = vsel %vm951_vm13, %v941_v9, %v953_v1 }
 0x364   : > { %959 = vrot.lane.b32.xlu1 %v955_v11, %s2051_s20 }
 0x36b   : > { %v1682_v12 = vpop.f32.mrb[6].mxu1 }
 0x36c   : > { %v1047_v13 = vadd.f32 %v1682_v12, %v865_v4  ;;  %v1041_v14 = vpop.f32.mrb[7].mxu1 }
 0x36d   : > { %v1042_v15 = vadd.f32 %v1041_v14, %v860_v6 }
 0x36e   : > { %1555 = vst.msk [vmem:[%s2331_s26 + $0x18] sm:$0xff] %vm470_vm4, %v1047_v13  ;;  %vm1054_vm14 = vcmp.gt.f32.partialorder %v1047_v13, 0.0  ;;  %v1056_v16 = vmul.f32 0.2, %v1047_v13 }
 0x36f   : > { %1554 = vst.msk [vmem:[%s2331_s26 + $0x10] sm:$0xff] %vm470_vm4, %v1042_v15  ;;  %vm1053_vm15 = vcmp.gt.f32.partialorder %v1042_v15, 0.0  ;;  %v1055_v17 = vmul.f32 0.2, %v1042_v15  ;;  %s2053_s26 = smov [#allocation9]  }
 0x370   : > { %v1058_v18 = vsel %vm1054_vm14, %v1047_v13, %v1056_v16 }
 0x371   : > { %1063 = vrot.lane.b32.xlu1 %v1058_v18, %s2051_s20  ;;  %v1057_v19 = vsel %vm1053_vm15, %v1042_v15, %v1055_v17 }
 0x372   : > { %1061 = vrot.lane.b32.xlu0 %v1057_v19, %s2051_s20 }
 0x3d2   : > { %v962_v20 = vpop.permute.xlu1 %961 }
 0x3d3   : > { %966 = vst.msk [vmem:[#allocation3 + $0x8] sm:$0xff] %vm752_vm10, %v962_v20 }
 0x3d6   : > { %v960_v21 = vpop.permute.xlu1 %959 }
 0x3d7   : > { %965 = vst.msk [vmem:[#allocation3] sm:$0xff] %vm752_vm10, %v960_v21 }
 0x3da   : > { %v1075_v22 = vld [vmem:[#allocation3 + $0x8] sm:$0xff] }
 0x3de   : > { %v1074_v23 = vld [vmem:[#allocation3] sm:$0xff] }
 0x3df   : > { %v1838_v24 = vpack.i.bf16 %v1075_v22, %v1074_v23  ;;  %v1741_v25 = vpack.c.bf16 %v1075_v22, %v1074_v23 }
 0x3e1   : > { %1839 = vrot.lane.b32.xlu0 %v1838_v24, %s2049_s23  ;;  %1742 = vmatprep.subr.bf16.mxu0 %v1741_v25 }
 0x3e2   : > { %1744 = vmatpush3.bf16.msra.mxu0 %v1741_v25 }
 0x3e3   : > { %v1064_v26 = vpop.permute.xlu1 %1063 }
 0x3e4   : > { %1069 = vst.msk [vmem:[#allocation3 + $0x18] sm:$0xff] %vm752_vm10, %v1064_v26  ;;  %v1062_v27 = vpop.permute.xlu0 %1061 }
 0x3e5   : > { %1068 = vst.msk [vmem:[#allocation3 + $0x10] sm:$0xff] %vm752_vm10, %v1062_v27  ;;  %1849 = vrot.lane.b32.xlu0 %v1838_v24, %s2052_s17  ;;  %s1292_s17 = sand.u32 1, %s2145_s25  }
 0x3e6   : > { %s2390_s30 = scalar_lea.sflag [#allocation10], %s1292_s17 }
 0x3e9   : > { %1107 = vperm.xlu0 %1837, %v1073_v28  }
 0x3eb   : > { %v1077_v29 = vld [vmem:[#allocation3 + $0x18] sm:$0xff] }
 0x3ec   : > { %v1076_v31 = vld [vmem:[#allocation3 + $0x10] sm:$0xff] }
 0x3ed   : > { %v1843_v32 = vpack.i.bf16 %v1077_v29, %v1076_v31  ;;  %v1745_v33 = vpack.c.bf16 %v1077_v29, %v1076_v31 }
 0x3ef   : > { %1844 = vrot.lane.b32.xlu1 %v1843_v32, %s2049_s23  ;;  %1746 = vmatprep.subr.bf16.mxu0 %v1745_v33  ;;  %s2554_s23 = sshll.u32 %s2145_s25, 9 }
 0x3f0   : > { %1748 = vmatpush3.bf16.msra.mxu0 %v1745_v33  ;;  %s2388_s0 = scalar_lea.hbm %s2546_s10, %s2554_s23 }
 0x3f3   : > { %1102 = vperm.xlu1 %1836, %v1072_v34  }
 0x3f7   : > { %1208 = vperm.xlu1 %1836, %v1203_v35  }
 0x453   : > { %v1840_v36 = vpop.permute.xlu0 %1839 }
 0x454   : > { %v1842_v37 = vunpack.i.h.bf16 %v1840_v36  ;;  %v1841_v38 = vunpack.i.l.bf16 %v1840_v36 }
 0x456   : > { %v1749_v39 = vpack.c.bf16 %v1842_v37, %v1841_v38 }
 0x457   : > { %v1850_v40 = vpop.permute.xlu0 %1849 }
 0x458   : > { %1750 = vmatprep.subr.bf16.mxu0 %v1749_v39  ;;  %v1852_v42 = vunpack.i.h.bf16 %v1850_v40  ;;  %v1851_v43 = vunpack.i.l.bf16 %v1850_v40 }
 0x459   : > { %1752 = vmatpush3.bf16.msra.mxu0 %v1749_v39 }
 0x45a   : > { %v1757_v47 = vpack.c.bf16 %v1852_v42, %v1851_v43 }
 0x461   : > { %v1845_v41 = vpop.permute.xlu1 %1844 }
 0x462   : > { %v1847_v44 = vunpack.i.h.bf16 %v1845_v41  ;;  %v1846_v45 = vunpack.i.l.bf16 %v1845_v41 }
 0x464   : > { %v1753_v46 = vpack.c.bf16 %v1847_v44, %v1846_v45 }
 0x466   : > { %1754 = vmatprep.subr.bf16.mxu0 %v1753_v46 }
 0x467   : > { %1756 = vmatpush3.bf16.msra.mxu0 %v1753_v46 }
 0x468   : > { %1758 = vmatprep.subr.bf16.mxu0 %v1757_v47  ;;  %v1108_v49 = vpop.permute.xlu0 %1107 }
 0x46b   : > { %1760 = vmatpush3.bf16.msra.mxu0 %v1757_v47 }
 0x46e   : > { %1704 = vmatmul.mubr.msk.f32.vlgmr.msra.gmra.mrb[4].mxu0 %vm1110_vm0, %v1071_v48 }
 0x472   : > { %v1103_v51 = vpop.permute.xlu1 %1102 }
 0x541   : > { %v1705_v50 = vpop.f32.mrb[4].mxu0 }
 0x542   : > { %v1189_v52 = vadd.f32 %v1705_v50, %v1108_v49  ;;  %v1183_v53 = vpop.f32.mrb[5].mxu0 }
 0x543   : > { %v1184_v54 = vadd.f32 %v1183_v53, %v1103_v51 }
 0x544   : > { %1193 = vst.msk [vmem:[%s452_s27 + $0x8] sm:$0xff] %vm470_vm4, %v1189_v52  ;;  %vm1195_vm1 = vcmp.gt.f32.partialorder %v1189_v52, 0.0  ;;  %v1197_v55 = vmul.f32 0.2, %v1189_v52 }
 0x545   : > { %1192 = vst.msk [vmem:[%s452_s27] sm:$0xff] %vm470_vm4, %v1184_v54  ;;  %vm1194_vm2 = vcmp.gt.f32.partialorder %v1184_v54, 0.0  ;;  %v1196_v56 = vmul.f32 0.2, %v1184_v54  ;;  %s1887_s27 = sshll.u32 %s2053_s26, 4  ;;  %s1888_s27 = int_to_ptr.vmem [resolvable:$false] %s1887_s27 }
 0x546   : > { %v1199_v57 = vsel %vm1195_vm1, %v1189_v52, %v1197_v55  ;;  %s1889_s1 = scalar_lea.vmem %s1888_s27, 1024  ;;  %p1890_p8 = scmp.lt.s32.totalorder %s2377_s29, %s1888_s27 }
 0x547   : > { %1201 = vst.msk [vmem:[#allocation4 + $0x8] sm:$0xff] %vm470_vm4, %v1199_v57  ;;  %v1198_v58 = vsel %vm1194_vm2, %v1184_v54, %v1196_v56  ;;  %p1891_p10 = scmp.lt.s32.totalorder %s1889_s1, %s1883_s14 }
 0x548   : > { %1200 = vst.msk [vmem:[#allocation4] sm:$0xff] %vm470_vm4, %v1198_v58 }
 0x549   : > { %p1892_p0 = por %p1891_p10, %p1890_p8 }
 0x54b   : > { %p1893_p2 = pnand %p1892_p0, %p1886_p13 }
 0x54e   : > { %v1205_v59 = vld [vmem:[#allocation4 + $0x8] sm:$0xff] }
 0x54f   : > { %v1204_v60 = vld [vmem:[#allocation4] sm:$0xff] }
 0x550   : > { %v1762_v61 = vpack.c.bf16 %v1205_v59, %v1204_v60 }
 0x552   : > { %1763 = vmatpush3.bf16.msra.mxu1 %v1762_v61 }
 0x555   : > { %1711 = vmatmul.mubr.msk.f32.vlgmr.msra.gmra.mrb[8].mxu1 %vm1211_vm3, %v1202_v62 }
 0x556   : > { %1896 = shalt.err (!%p1893_p2)
}
 0x557   : > { %s1897_s17 = scalar_lea.hbm %s2388_s0, 512  ;;  %s1901_s26 = scalar_lea.hbm %s2546_s10, 1024 }
 0x558   : > { %p1898_p4 = scmp.ne.s32.totalorder %s2388_s0, %s1897_s17  ;;  %p1902_p9 = scmp.lt.u32.totalorder %s2388_s0, %s2546_s10 }
 0x559   : > { %p1903_p1 = scmp.lt.u32.totalorder %s1901_s26, %s1897_s17  ;;  %p1905_p6 = scmp.lt.u32.totalorder %s1897_s17, %s2388_s0 }
 0x55a   : > { %p1899_p5 = pnand %p1898_p4, %p2575_p11 }
 0x55b   : > { %p1904_p3 = por %p1903_p1, %p1902_p9 }
 0x55c   : > { %p1900_p7 = pneg %p1899_p5 }
 0x55d   : > { %p1906_p12 = por %p1905_p6, %p1904_p3 }
 0x55f   : > { %p1907_p13 = pnand %p1906_p12, %p1900_p7 }
 0x561   : > { %1910 = shalt.err (!%p1907_p13)
}
 0x562   : > { %s2054_s1 = smov 128   ;;  %s2055_s14 = smov 8  }
 0x563   : > { %1767 = dma.vmem_to_hbm [thread:$0]  (%p2575_p11), %s2377_s29, 512, %s2388_s0, %s2390_s30, %s2054_s1, %s2054_s1, %s2055_s14  }
 0x564   : > { %s2576_s23 = sshll.u32 %s2145_s25, 9  ;;  %s1316_s26 = sshll.u32 %s2288_s19, 4  ;;  %s2426_s26 = int_to_ptr.vmem [resolvable:$true] %s1316_s26 }
 0x565   : > { %s2422_s13 = scalar_lea.hbm %s2545_s9, %s2576_s23  ;;  %s1575_s27 = sshll.u32 %s2145_s25, 8 }
 0x566   : > { %s2431_s4 = scalar_lea.hbm %s2547_s11, %s1575_s27  ;;  %s1288_s5 = scalar_lea.sflag [#allocation7], %s2230_s28 }
 0x567   : > { %s1911_s0 = scalar_lea.vmem %s2426_s26, 512  ;;  %s2056_s29 = smov [#allocation8]  }
 0x568   : > { %p1912_p8 = scmp.ne.s32.totalorder %s2426_s26, %s1911_s0  ;;  %s1915_s23 = sshll.u32 %s2056_s29, 4  ;;  %s1916_s23 = int_to_ptr.vmem [resolvable:$false] %s1915_s23 }
 0x569   : > { %s1917_s19 = scalar_lea.vmem %s1916_s23, 1024  ;;  %p1918_p2 = scmp.lt.s32.totalorder %s2426_s26, %s1916_s23 }
 0x56a   : > { %p1913_p10 = pnand %p1912_p8, %p2575_p11  ;;  %p1919_p4 = scmp.lt.s32.totalorder %s1917_s19, %s1911_s0 }
 0x56c   : > { %p1914_p0 = pneg %p1913_p10  ;;  %p1920_p5 = por %p1919_p4, %p1918_p2 }
 0x56e   : > { %p1921_p7 = pnand %p1920_p5, %p1914_p0 }
 0x570   : > { %1924 = shalt.err (!%p1921_p7)
}
 0x571   : > { %s1925_s2 = scalar_lea.hbm %s2422_s13, 512  ;;  %s1929_s20 = scalar_lea.hbm %s2545_s9, 1024 }
 0x572   : > { %p1926_p9 = scmp.ne.s32.totalorder %s2422_s13, %s1925_s2  ;;  %p1930_p6 = scmp.lt.u32.totalorder %s2422_s13, %s2545_s9 }
 0x573   : > { %p1931_p12 = scmp.lt.u32.totalorder %s1929_s20, %s1925_s2  ;;  %p1933_p8 = scmp.lt.u32.totalorder %s1925_s2, %s2422_s13 }
 0x574   : > { %p1927_p1 = pnand %p1926_p9, %p2575_p11 }
 0x575   : > { %p1932_p13 = por %p1931_p12, %p1930_p6 }
 0x576   : > { %p1928_p3 = pneg %p1927_p1 }
 0x577   : > { %p1934_p10 = por %p1933_p8, %p1932_p13 }
 0x579   : > { %p1935_p0 = pnand %p1934_p10, %p1928_p3 }
 0x57b   : > { %1938 = shalt.err (!%p1935_p0)
}
 0x57c   : > { %1766 = dma.vmem_to_hbm [thread:$0]  (%p2575_p11), %s2426_s26, 512, %s2422_s13, %s1288_s5, %s2054_s1, %s2054_s1, %s2055_s14  }
 0x57d   : > { %s1939_s0 = scalar_lea.vmem %s2379_s18, 256  ;;  %s2057_s23 = smov [#allocation11]  }
 0x57e   : > { %p1940_p2 = scmp.ne.s32.totalorder %s2379_s18, %s1939_s0  ;;  %s1943_s19 = sshll.u32 %s2057_s23, 4  ;;  %s1944_s19 = int_to_ptr.vmem [resolvable:$false] %s1943_s19 }
 0x57f   : > { %s1945_s2 = scalar_lea.vmem %s1944_s19, 512  ;;  %p1946_p7 = scmp.lt.s32.totalorder %s2379_s18, %s1944_s19 }
 0x580   : > { %p1941_p4 = pnand %p1940_p2, %p2575_p11  ;;  %p1947_p9 = scmp.lt.s32.totalorder %s1945_s2, %s1939_s0 }
 0x582   : > { %p1942_p5 = pneg %p1941_p4  ;;  %p1948_p1 = por %p1947_p9, %p1946_p7 }
 0x584   : > { %p1949_p3 = pnand %p1948_p1, %p1942_p5 }
 0x586   : > { %1952 = shalt.err (!%p1949_p3)
}
 0x587   : > { %s1953_s5 = scalar_lea.hbm %s2431_s4, 256  ;;  %s1957_s3 = scalar_lea.hbm %s2547_s11, 512 }
 0x588   : > { %p1954_p6 = scmp.ne.s32.totalorder %s2431_s4, %s1953_s5  ;;  %p1958_p8 = scmp.lt.u32.totalorder %s2431_s4, %s2547_s11 }
 0x589   : > { %p1959_p10 = scmp.lt.u32.totalorder %s1957_s3, %s1953_s5  ;;  %p1961_p2 = scmp.lt.u32.totalorder %s1953_s5, %s2431_s4 }
 0x58a   : > { %p1955_p12 = pnand %p1954_p6, %p2575_p11 }
 0x58b   : > { %p1960_p0 = por %p1959_p10, %p1958_p8 }
 0x58c   : > { %p1956_p13 = pneg %p1955_p12 }
 0x58d   : > { %p1962_p4 = por %p1961_p2, %p1960_p0 }
 0x58f   : > { %p1963_p5 = pnand %p1962_p4, %p1956_p13 }
 0x591   : > { %1966 = shalt.err (!%p1963_p5)
}
 0x592   : > { %1768 = dma.vmem_to_hbm [thread:$0]  (%p2575_p11), %s2379_s18, 256, %s2431_s4, %s2390_s30, %s2054_s1, %s2054_s1, %s2055_s14   ;;  %v1209_v63 = vpop.permute.xlu1 %1208  ;;  %vm1285_vm4 = vcmask 519168  }
 0x593   : > { %s1538_s27 = sshll.u32 %s2230_s28, 2  ;;  %s1569_s29 = sshll.u32 %s2145_s25, 6 }
 0x594   : > { %s459_s0 = scalar_lea.vmem [#allocation12], %s1538_s27  ;;  %s2490_s5 = scalar_lea.hbm %s2548_s12, %s1569_s29 }
 0x595   : > { %s1364_s23 = sshll.u32 %s459_s0, 4  ;;  %s1303_s4 = scalar_lea.sflag [#allocation13], %s2230_s28  ;;  %s2492_s23 = int_to_ptr.vmem [resolvable:$true] %s1364_s23 }
 0x596   : > { %s1967_s25 = scalar_lea.vmem %s2492_s23, 64  ;;  %s2058_s18 = smov [#allocation12]  }
 0x597   : > { %p1968_p7 = scmp.ne.s32.totalorder %s2492_s23, %s1967_s25  ;;  %s1971_s30 = sshll.u32 %s2058_s18, 4  ;;  %s1972_s30 = int_to_ptr.vmem [resolvable:$false] %s1971_s30 }
 0x598   : > { %s1973_s1 = scalar_lea.vmem %s1972_s30, 128  ;;  %p1974_p3 = scmp.lt.s32.totalorder %s2492_s23, %s1972_s30 }
 0x599   : > { %p1969_p9 = pnand %p1968_p7, %p2575_p11  ;;  %p1975_p6 = scmp.lt.s32.totalorder %s1973_s1, %s1967_s25 }
 0x59b   : > { %p1970_p1 = pneg %p1969_p9  ;;  %p1976_p12 = por %p1975_p6, %p1974_p3 }
 0x59d   : > { %p1977_p13 = pnand %p1976_p12, %p1970_p1 }
 0x628   : > { %v1281_v2 = vpop.f32.mrb[8].mxu1 }
 0x629   : > { %v1282_v3 = vadd.f32 %v1281_v2, %v1209_v63  ;;  %v1712_v4 = vpop.f32.mrb[9].mxu1 }
 0x62b   : > { %1286 = vst.msk [vmem:[%s459_s0] sm:$0xf] %vm1285_vm4, %v1282_v3 }
 0x62c   : > { %1980 = shalt.err (!%p1977_p13)
}
 0x62d   : > { %s1981_s28 = scalar_lea.hbm %s2490_s5, 64  ;;  %s1985_s26 = scalar_lea.hbm %s2548_s12, 128 }
 0x62e   : > { %p1982_p8 = scmp.ne.s32.totalorder %s2490_s5, %s1981_s28  ;;  %p1986_p2 = scmp.lt.u32.totalorder %s2490_s5, %s2548_s12 }
 0x62f   : > { %p1987_p4 = scmp.lt.u32.totalorder %s1985_s26, %s1981_s28  ;;  %p1989_p7 = scmp.lt.u32.totalorder %s1981_s28, %s2490_s5 }
 0x630   : > { %p1983_p10 = pnand %p1982_p8, %p2575_p11 }
 0x631   : > { %p1988_p5 = por %p1987_p4, %p1986_p2 }
 0x632   : > { %p1984_p0 = pneg %p1983_p10 }
 0x633   : > { %p1990_p9 = por %p1989_p7, %p1988_p5 }
 0x635   : > { %p1991_p1 = pnand %p1990_p9, %p1984_p0 }
 0x637   : > { %1994 = shalt.err (!%p1991_p1)
}
 0x638   : > { %1769 = dma.vmem_to_hbm [thread:$0]  (%p2575_p11), %s2492_s23, 64, %s2490_s5, %s1303_s4  }
 0x639 PF: > { %s1376_s20 = sand.u32 1, %s2029_s21   ;;  %p2577_p3 = scmp.ne.s32.totalorder %s2567_s16, 0 }
 0x63a   : > { %p2578_p6 = scmp.ge.s32.totalorder %s2041_s24, 2  ;;  %s1377_s27 = scalar_lea.sflag [#allocation7], %s1376_s20 }
 0x63c   : > { %p1779_p12 = pnand %p2578_p6, %p2577_p3 }
 0x63e   : > { %2016 = dma.done.wait (!%p1779_p12), %s1377_s27, 512  }
 0x63f   : > { %2018 = vsyncadd (!%p1779_p12), %s1377_s27, 4294966784  ;;  %s2579_s29 = sadd.s32 4294967294, %s2041_s24  }
 0x640   : > { %s1385_s0 = sand.u32 1, %s2579_s29  }
 0x641   : > { %s1386_s19 = scalar_lea.sflag [#allocation10], %s1385_s0 }
 0x642   : > { %2020 = dma.done.wait (!%p1779_p12), %s1386_s19, 768  }
 0x643   : > { %2022 = vsyncadd (!%p1779_p12), %s1386_s19, 4294966528  ;;  %s1404_s15 = scalar_lea.sflag [#allocation13], %s1376_s20 }
 0x644   : > { %2024 = dma.done.wait (!%p1779_p12), %s1404_s15, 64  }
 0x645   : > { %2026 = vsyncadd (!%p1779_p12), %s1404_s15, 4294967232  ;;  %s2580_s24 = sld [smem:[#allocation19_spill]]  ;;  %s2581_s23 = sld [smem:[#allocation18_spill]] }
 0x646   : > { %s2582_s2 = sld [smem:[#allocation20_spill]]  ;;  %s2583_s21 = smov %s2033_s22 }
 0x64b   : > { %p32_p11 = scmp.ge.s32.totalorder %s2580_s24, 4   ;;  %s2584_s22 = smov %s2581_s23 }
 0x64c   : > { %s2585_s23 = smov %s2582_s2 }
 0x64d   :  { %34 = sbr.rel (!%p32_p11) target bundleno = 16 (0x10), region = 158 }
 0x654   :  { %1409 = vsyncpa [#allocation6], 1 }
 0x655   :  { %1411 = vsyncpa [#allocation6 + $0x1], 1 }
 0x656   :  { %1412 = vsyncpa [#allocation7], 1 }
 0x657   :  { %1414 = vsyncpa [#allocation7 + $0x1], 1 }
 0x658   :  { %1415 = vsyncpa [#allocation10], 1 }
 0x659   :  { %1417 = vsyncpa [#allocation10 + $0x1], 1 }
 0x65a   :  { %1418 = vsyncpa [#allocation13], 1 }
 0x65b   :  { %1420 = vsyncpa [#allocation13 + $0x1], 1 }

</bundles_post_ra>
